<compile_context>
chip_gen: v5e
topology: v5e:2x2
jax: 0.10.0
libtpu: 0.0.40
codegen_flags: <defaults>
</compile_context>

<pallas_src>
import functools

import jax
import jax.numpy as jnp
import numpy as np
from jax.experimental import pallas as pl
from jax.experimental.pallas import tpu as pltpu

LN_EPS = 1e-5


def _layer_norm(t, w, b):
    mu = jnp.mean(t, axis=-1, keepdims=True)
    var = jnp.mean(jnp.square(t - mu), axis=-1, keepdims=True)
    return (t - mu) * jax.lax.rsqrt(var + LN_EPS) * w + b


def _perceiver_attention_kernel(x_ref, lat_ref, ln_ref, wq_ref, wkv_ref,
                                wout_ref, out_ref, *, heads, dim_head):
    # Per-batch block: x_ref (N, D), lat_ref (M, D), out_ref (M, D).
    N, D = x_ref.shape
    M, _ = lat_ref.shape
    H, d = heads, dim_head
    inner = H * d
    Nk = N + M

    ln = ln_ref[...]                                            # (6, D) f32

    # LayerNorms in f32 (elementwise math stays f32 on all generations).
    xn = _layer_norm(x_ref[...].astype(jnp.float32), ln[0], ln[1])     # (N, D)
    latn = _layer_norm(lat_ref[...].astype(jnp.float32), ln[2], ln[3])  # (M, D)

    # kv over the union of context and latent tokens (torch: cat((x, latents), -2)).
    # Sublane concat of 8-aligned row blocks -> no lane relayout.
    kv_in = jnp.concatenate([xn, latn], axis=0)                 # (Nk, D)

    bf = lambda t: t.astype(jnp.bfloat16)   # MXU operands bf16, f32 accumulate

    # Lane-dense projections: one matmul per input, all heads at once.
    # (q scale is pre-folded into wq in the wrapper.)
    q = jnp.dot(bf(latn), bf(wq_ref[...]),
                preferred_element_type=jnp.float32)             # (M, inner)
    kv = jnp.dot(bf(kv_in), bf(wkv_ref[...]),
                 preferred_element_type=jnp.float32)            # (Nk, 2*inner)

    # Head-major views of the (small) projection results only.
    qh = q.reshape(M, H, d).transpose(1, 0, 2)                  # (H, M, d)
    kh = kv[:, :inner].reshape(Nk, H, d).transpose(1, 0, 2)     # (H, Nk, d)
    vh = kv[:, inner:].reshape(Nk, H, d).transpose(1, 0, 2)     # (H, Nk, d)

    # Attention with a single exact softmax in f32.
    # TODO(synk): optional `mask` argument of the torch forward not implemented.
    s = jnp.einsum('hmd,hkd->hmk', bf(qh), bf(kh),
                   preferred_element_type=jnp.float32)          # (H, M, Nk)
    s = s - jnp.max(s, axis=-1, keepdims=True)
    p = jnp.exp(s)
    p = p / jnp.sum(p, axis=-1, keepdims=True)                  # exact divide

    o = jnp.einsum('hmk,hkd->hmd', bf(p), bf(vh),
                   preferred_element_type=jnp.float32)          # (H, M, d)

    # Merge heads and fold the head reduction into one K = H*d MXU contraction
    # (concat_h(o_h) @ Wout), then the output LayerNorm.
    o_flat = o.transpose(1, 0, 2).reshape(M, inner)             # (M, inner)
    out = jnp.dot(bf(o_flat), bf(wout_ref[...]),
                  preferred_element_type=jnp.float32)           # (M, D)
    out = _layer_norm(out, ln[4], ln[5])
    out_ref[...] = out.astype(out_ref.dtype)


def perceiver_attention(x, latents, params, *, heads, dim_head):
    B, N, D = x.shape
    _, M, _ = latents.shape
    inner = heads * dim_head
    lnx_w, lnx_b, lnl_w, lnl_b, wq, wkv, wout, lno_w, lno_b = params

    # Host-side (one-time) packing:
    #   * six LayerNorm vectors -> one (6, D) operand
    #   * q scale folded into wq
    #   * wkv / wout kept lane-dense: (D, 2*inner) and (inner, D)
    ln_pack = jnp.stack([lnx_w, lnx_b, lnl_w, lnl_b, lno_w, lno_b], axis=0)
    wq_scaled = wq * (dim_head ** -0.5)

    kernel = functools.partial(_perceiver_attention_kernel,
                               heads=heads, dim_head=dim_head)

    resident2 = lambda shape: pl.BlockSpec(shape, lambda b: (0, 0))

    return pl.pallas_call(
        kernel,
        out_shape=jax.ShapeDtypeStruct((B, M, D), x.dtype),
        grid=(B,),                                           # one batch per step
        in_specs=[
            pl.BlockSpec((None, N, D), lambda b: (b, 0, 0)),  # x (batch-sliced)
            pl.BlockSpec((None, M, D), lambda b: (b, 0, 0)),  # latents
            resident2((6, D)),                                # packed LN params
            resident2((D, inner)),                            # wq (scale folded)
            resident2((D, 2 * inner)),                        # wkv
            resident2((inner, D)),                            # wout
        ],
        out_specs=pl.BlockSpec((None, M, D), lambda b: (b, 0, 0)),
        compiler_params=pltpu.CompilerParams(
            dimension_semantics=("parallel",)),               # megacore on v7x
    )(x, latents, ln_pack, wq_scaled, wkv, wout)


def perceiver_attention_reference(x, latents, params, *, heads, dim_head):
    """Pure-JAX (f32) reference mirroring the torch forward (mask=None)."""
    lnx_w, lnx_b, lnl_w, lnl_b, wq, wkv, wout, lno_w, lno_b = params
    inner = heads * dim_head
    xn = _layer_norm(x, lnx_w, lnx_b)
    latn = _layer_norm(latents, lnl_w, lnl_b)
    q = latn @ wq
    kv_in = jnp.concatenate([xn, latn], axis=1)
    kv = kv_in @ wkv
    k, v = kv[..., :inner], kv[..., inner:]

    def split_heads(t):
        b, n, _ = t.shape
        return t.reshape(b, n, heads, dim_head).transpose(0, 2, 1, 3)

    q, k, v = map(split_heads, (q, k, v))
    q = q * dim_head ** -0.5
    sim = jnp.einsum('bhid,bhjd->bhij', q, k)
    attn = jax.nn.softmax(sim, axis=-1)
    o = jnp.einsum('bhij,bhjd->bhid', attn, v)
    o = o.transpose(0, 2, 1, 3).reshape(x.shape[0], latents.shape[1], inner)
    out = o @ wout
    return _layer_norm(out, lno_w, lno_b)


if __name__ == "__main__":
    # Small shapes consistent with the module.
    B, N, M = 2, 16, 8          # batch, context tokens, latent tokens
    DIM, DIM_HEAD, HEADS = 32, 8, 4
    INNER = DIM_HEAD * HEADS

    key = jax.random.PRNGKey(0)
    ks = jax.random.split(key, 12)

    x = jax.random.normal(ks[0], (B, N, DIM), dtype=jnp.float32)
    latents = jax.random.normal(ks[1], (B, M, DIM), dtype=jnp.float32)

    params = (
        1.0 + 0.1 * jax.random.normal(ks[2], (DIM,), jnp.float32),       # norm.weight
        0.1 * jax.random.normal(ks[3], (DIM,), jnp.float32),             # norm.bias
        1.0 + 0.1 * jax.random.normal(ks[4], (DIM,), jnp.float32),       # norm_latents.weight
        0.1 * jax.random.normal(ks[5], (DIM,), jnp.float32),             # norm_latents.bias
        0.02 * jax.random.normal(ks[6], (DIM, INNER), jnp.float32),      # to_q
        0.02 * jax.random.normal(ks[7], (DIM, 2 * INNER), jnp.float32),  # to_kv
        0.02 * jax.random.normal(ks[8], (INNER, DIM), jnp.float32),      # to_out[0]
        1.0 + 0.1 * jax.random.normal(ks[9], (DIM,), jnp.float32),       # to_out[1].weight
        0.1 * jax.random.normal(ks[10], (DIM,), jnp.float32),            # to_out[1].bias
    )

    out = perceiver_attention(x, latents, params, heads=HEADS, dim_head=DIM_HEAD)
    out = jax.block_until_ready(out)

    ref = perceiver_attention_reference(
        x, latents, params, heads=HEADS, dim_head=DIM_HEAD)
    ref = jax.block_until_ready(ref)

    assert out.shape == (B, M, DIM)
    # Tolerance accounts for bf16 MXU operands (f32 accumulation) vs. the
    # pure-f32 reference.
    np.testing.assert_allclose(np.asarray(out), np.asarray(ref),
                               rtol=3e-2, atol=3e-2)
    print("KERNEL_OK")
</pallas_src>

<mosaic_0001>
module attributes {stable_mosaic.version = 11 : i64} {
  func.func @_perceiver_attention_kernel(%arg0: i32, %arg1: memref<1x16x32xf32, #tpu.memory_space<vmem>>, %arg2: memref<1x8x32xf32, #tpu.memory_space<vmem>>, %arg3: memref<6x32xf32, #tpu.memory_space<vmem>>, %arg4: memref<32x32xf32, #tpu.memory_space<vmem>>, %arg5: memref<32x64xf32, #tpu.memory_space<vmem>>, %arg6: memref<32x32xf32, #tpu.memory_space<vmem>>, %arg7: memref<1x8x32xf32, #tpu.memory_space<vmem>>) attributes {dimension_semantics = [#tpu.dimension_semantics<parallel>], iteration_bounds = array<i64: 2>, scalar_prefetch = 0 : i64, scratch_operands = 0 : i64, tpu.core_type = #tpu.core_type<tc>, window_params = [{transform_indices = @transform_0, window_bounds = array<i64: 1, 16, 32>}, {transform_indices = @transform_1, window_bounds = array<i64: 1, 8, 32>}, {pipeline_mode = #tpu.pipeline_mode<synchronous>, transform_indices = @transform_2, window_bounds = array<i64: 6, 32>}, {pipeline_mode = #tpu.pipeline_mode<synchronous>, transform_indices = @transform_3, window_bounds = array<i64: 32, 32>}, {pipeline_mode = #tpu.pipeline_mode<synchronous>, transform_indices = @transform_4, window_bounds = array<i64: 32, 64>}, {pipeline_mode = #tpu.pipeline_mode<synchronous>, transform_indices = @transform_5, window_bounds = array<i64: 32, 32>}, {transform_indices = @transform_6, window_bounds = array<i64: 1, 8, 32>}]} {
    %c0 = arith.constant 0 : index
    %c0_0 = arith.constant 0 : index
    %0 = vector.load %arg3[%c0, %c0_0] : memref<6x32xf32, #tpu.memory_space<vmem>>, vector<6x32xf32>
    %c0_1 = arith.constant 0 : index
    %c0_2 = arith.constant 0 : index
    %c0_3 = arith.constant 0 : index
    %1 = vector.load %arg1[%c0_1, %c0_2, %c0_3] : memref<1x16x32xf32, #tpu.memory_space<vmem>>, vector<1x16x32xf32>
    %2 = vector.shape_cast %1 : vector<1x16x32xf32> to vector<16x32xf32>
    %3 = vector.extract_strided_slice %0 {offsets = [0, 0], sizes = [1, 32], strides = [1, 1]} : vector<6x32xf32> to vector<1x32xf32>
    %4 = vector.shape_cast %3 : vector<1x32xf32> to vector<32xf32>
    %5 = vector.extract_strided_slice %0 {offsets = [1, 0], sizes = [1, 32], strides = [1, 1]} : vector<6x32xf32> to vector<1x32xf32>
    %6 = vector.shape_cast %5 : vector<1x32xf32> to vector<32xf32>
    %cst = arith.constant dense<0.000000e+00> : vector<16xf32>
    %7 = vector.multi_reduction <add>, %2, %cst [1] : vector<16x32xf32> to vector<16xf32>
    %8 = vector.shape_cast %7 : vector<16xf32> to vector<16x1xf32>
    %cst_4 = arith.constant 3.200000e+01 : f32
    %9 = vector.broadcast %cst_4 : f32 to vector<16x1xf32>
    %10 = arith.divf %8, %9 : vector<16x1xf32>
    %11 = vector.broadcast %10 : vector<16x1xf32> to vector<16x32xf32>
    %12 = arith.subf %2, %11 : vector<16x32xf32>
    %13 = arith.mulf %12, %12 : vector<16x32xf32>
    %cst_5 = arith.constant dense<0.000000e+00> : vector<16xf32>
    %14 = vector.multi_reduction <add>, %13, %cst_5 [1] : vector<16x32xf32> to vector<16xf32>
    %15 = vector.shape_cast %14 : vector<16xf32> to vector<16x1xf32>
    %cst_6 = arith.constant 3.200000e+01 : f32
    %16 = vector.broadcast %cst_6 : f32 to vector<16x1xf32>
    %17 = arith.divf %15, %16 : vector<16x1xf32>
    %18 = vector.broadcast %10 : vector<16x1xf32> to vector<16x32xf32>
    %19 = arith.subf %2, %18 : vector<16x32xf32>
    %cst_7 = arith.constant 9.99999974E-6 : f32
    %20 = vector.broadcast %cst_7 : f32 to vector<16x1xf32>
    %21 = arith.addf %17, %20 : vector<16x1xf32>
    %22 = math.rsqrt %21 : vector<16x1xf32>
    %23 = vector.broadcast %22 : vector<16x1xf32> to vector<16x32xf32>
    %24 = arith.mulf %19, %23 : vector<16x32xf32>
    %25 = vector.shape_cast %4 : vector<32xf32> to vector<1x32xf32>
    %26 = vector.broadcast %25 : vector<1x32xf32> to vector<16x32xf32>
    %27 = arith.mulf %24, %26 : vector<16x32xf32>
    %28 = vector.shape_cast %6 : vector<32xf32> to vector<1x32xf32>
    %29 = vector.broadcast %28 : vector<1x32xf32> to vector<16x32xf32>
    %30 = arith.addf %27, %29 : vector<16x32xf32>
    %c0_8 = arith.constant 0 : index
    %c0_9 = arith.constant 0 : index
    %c0_10 = arith.constant 0 : index
    %31 = vector.load %arg2[%c0_8, %c0_9, %c0_10] : memref<1x8x32xf32, #tpu.memory_space<vmem>>, vector<1x8x32xf32>
    %32 = vector.shape_cast %31 : vector<1x8x32xf32> to vector<8x32xf32>
    %33 = vector.extract_strided_slice %0 {offsets = [2, 0], sizes = [1, 32], strides = [1, 1]} : vector<6x32xf32> to vector<1x32xf32>
    %34 = vector.shape_cast %33 : vector<1x32xf32> to vector<32xf32>
    %35 = vector.extract_strided_slice %0 {offsets = [3, 0], sizes = [1, 32], strides = [1, 1]} : vector<6x32xf32> to vector<1x32xf32>
    %36 = vector.shape_cast %35 : vector<1x32xf32> to vector<32xf32>
    %cst_11 = arith.constant dense<0.000000e+00> : vector<8xf32>
    %37 = vector.multi_reduction <add>, %32, %cst_11 [1] : vector<8x32xf32> to vector<8xf32>
    %38 = vector.shape_cast %37 : vector<8xf32> to vector<8x1xf32>
    %cst_12 = arith.constant 3.200000e+01 : f32
    %39 = vector.broadcast %cst_12 : f32 to vector<8x1xf32>
    %40 = arith.divf %38, %39 : vector<8x1xf32>
    %41 = vector.broadcast %40 : vector<8x1xf32> to vector<8x32xf32>
    %42 = arith.subf %32, %41 : vector<8x32xf32>
    %43 = arith.mulf %42, %42 : vector<8x32xf32>
    %cst_13 = arith.constant dense<0.000000e+00> : vector<8xf32>
    %44 = vector.multi_reduction <add>, %43, %cst_13 [1] : vector<8x32xf32> to vector<8xf32>
    %45 = vector.shape_cast %44 : vector<8xf32> to vector<8x1xf32>
    %cst_14 = arith.constant 3.200000e+01 : f32
    %46 = vector.broadcast %cst_14 : f32 to vector<8x1xf32>
    %47 = arith.divf %45, %46 : vector<8x1xf32>
    %48 = vector.broadcast %40 : vector<8x1xf32> to vector<8x32xf32>
    %49 = arith.subf %32, %48 : vector<8x32xf32>
    %cst_15 = arith.constant 9.99999974E-6 : f32
    %50 = vector.broadcast %cst_15 : f32 to vector<8x1xf32>
    %51 = arith.addf %47, %50 : vector<8x1xf32>
    %52 = math.rsqrt %51 : vector<8x1xf32>
    %53 = vector.broadcast %52 : vector<8x1xf32> to vector<8x32xf32>
    %54 = arith.mulf %49, %53 : vector<8x32xf32>
    %55 = vector.shape_cast %34 : vector<32xf32> to vector<1x32xf32>
    %56 = vector.broadcast %55 : vector<1x32xf32> to vector<8x32xf32>
    %57 = arith.mulf %54, %56 : vector<8x32xf32>
    %58 = vector.shape_cast %36 : vector<32xf32> to vector<1x32xf32>
    %59 = vector.broadcast %58 : vector<1x32xf32> to vector<8x32xf32>
    %60 = arith.addf %57, %59 : vector<8x32xf32>
    %61 = tpu.concatenate %30, %60 in 0 : vector<16x32xf32>, vector<8x32xf32> -> vector<24x32xf32>
    %62 = arith.truncf %60 : vector<8x32xf32> to vector<8x32xbf16>
    %c0_16 = arith.constant 0 : index
    %c0_17 = arith.constant 0 : index
    %63 = vector.load %arg4[%c0_16, %c0_17] : memref<32x32xf32, #tpu.memory_space<vmem>>, vector<32x32xf32>
    %64 = arith.truncf %63 : vector<32x32xf32> to vector<32x32xbf16>
    %cst_18 = arith.constant dense<0.000000e+00> : vector<8x32xf32>
    %65 = tpu.matmul %62, %64, %cst_18 {dimension_numbers = #tpu.dot_dimension_numbers<[1], [0], [0], [1], [0, 0, 1, 1], [], []>} : vector<8x32xbf16>, vector<32x32xbf16>, vector<8x32xf32> -> vector<8x32xf32>
    %66 = arith.truncf %61 : vector<24x32xf32> to vector<24x32xbf16>
    %c0_19 = arith.constant 0 : index
    %c0_20 = arith.constant 0 : index
    %67 = vector.load %arg5[%c0_19, %c0_20] : memref<32x64xf32, #tpu.memory_space<vmem>>, vector<32x64xf32>
    %68 = arith.truncf %67 : vector<32x64xf32> to vector<32x64xbf16>
    %cst_21 = arith.constant dense<0.000000e+00> : vector<24x64xf32>
    %69 = tpu.matmul %66, %68, %cst_21 {dimension_numbers = #tpu.dot_dimension_numbers<[1], [0], [0], [1], [0, 0, 1, 1], [], []>} : vector<24x32xbf16>, vector<32x64xbf16>, vector<24x64xf32> -> vector<24x64xf32>
    %70 = vector.shape_cast %65 : vector<8x32xf32> to vector<8x4x8xf32>
    %71 = tpu.transpose %70, [1, 0, 2] : vector<8x4x8xf32> -> vector<4x8x8xf32>
    %72 = vector.extract_strided_slice %69 {offsets = [0, 0], sizes = [24, 32], strides = [1, 1]} : vector<24x64xf32> to vector<24x32xf32>
    %73 = vector.shape_cast %72 : vector<24x32xf32> to vector<24x4x8xf32>
    %74 = tpu.transpose %73, [1, 0, 2] : vector<24x4x8xf32> -> vector<4x24x8xf32>
    %75 = vector.extract_strided_slice %69 {offsets = [0, 32], sizes = [24, 32], strides = [1, 1]} : vector<24x64xf32> to vector<24x32xf32>
    %76 = vector.shape_cast %75 : vector<24x32xf32> to vector<24x4x8xf32>
    %77 = tpu.transpose %76, [1, 0, 2] : vector<24x4x8xf32> -> vector<4x24x8xf32>
    %78 = arith.truncf %71 : vector<4x8x8xf32> to vector<4x8x8xbf16>
    %79 = arith.truncf %74 : vector<4x24x8xf32> to vector<4x24x8xbf16>
    "tpu.trace_start"() <{level = 10 : i32, message = "hmd,hkd->hmk"}> : () -> ()
    %cst_22 = arith.constant dense<0.000000e+00> : vector<4x8x24xf32>
    %80 = tpu.matmul %78, %79, %cst_22 {dimension_numbers = #tpu.dot_dimension_numbers<[2], [2], [1], [1], [0, 0, 0, 1, 1, 1], [0], [0]>} : vector<4x8x8xbf16>, vector<4x24x8xbf16>, vector<4x8x24xf32> -> vector<4x8x24xf32>
    "tpu.trace_stop"() : () -> ()
    %cst_23 = arith.constant dense<0xFF800000> : vector<4x8xf32>
    %81 = vector.multi_reduction <maximumf>, %80, %cst_23 [2] : vector<4x8x24xf32> to vector<4x8xf32>
    %82 = vector.shape_cast %81 : vector<4x8xf32> to vector<4x8x1xf32>
    %83 = vector.broadcast %82 : vector<4x8x1xf32> to vector<4x8x24xf32>
    %84 = arith.subf %80, %83 : vector<4x8x24xf32>
    %85 = math.exp %84 : vector<4x8x24xf32>
    %cst_24 = arith.constant dense<0.000000e+00> : vector<4x8xf32>
    %86 = vector.multi_reduction <add>, %85, %cst_24 [2] : vector<4x8x24xf32> to vector<4x8xf32>
    %87 = vector.shape_cast %86 : vector<4x8xf32> to vector<4x8x1xf32>
    %88 = vector.broadcast %87 : vector<4x8x1xf32> to vector<4x8x24xf32>
    %89 = arith.divf %85, %88 : vector<4x8x24xf32>
    %90 = arith.truncf %89 : vector<4x8x24xf32> to vector<4x8x24xbf16>
    %91 = arith.truncf %77 : vector<4x24x8xf32> to vector<4x24x8xbf16>
    "tpu.trace_start"() <{level = 10 : i32, message = "hmk,hkd->hmd"}> : () -> ()
    %cst_25 = arith.constant dense<0.000000e+00> : vector<4x8x8xf32>
    %92 = tpu.matmul %90, %91, %cst_25 {dimension_numbers = #tpu.dot_dimension_numbers<[2], [1], [1], [2], [0, 0, 0, 1, 1, 2], [0], [0]>} : vector<4x8x24xbf16>, vector<4x24x8xbf16>, vector<4x8x8xf32> -> vector<4x8x8xf32>
    "tpu.trace_stop"() : () -> ()
    %93 = tpu.transpose %92, [1, 0, 2] : vector<4x8x8xf32> -> vector<8x4x8xf32>
    %94 = vector.shape_cast %93 : vector<8x4x8xf32> to vector<8x32xf32>
    %95 = arith.truncf %94 : vector<8x32xf32> to vector<8x32xbf16>
    %c0_26 = arith.constant 0 : index
    %c0_27 = arith.constant 0 : index
    %96 = vector.load %arg6[%c0_26, %c0_27] : memref<32x32xf32, #tpu.memory_space<vmem>>, vector<32x32xf32>
    %97 = arith.truncf %96 : vector<32x32xf32> to vector<32x32xbf16>
    %cst_28 = arith.constant dense<0.000000e+00> : vector<8x32xf32>
    %98 = tpu.matmul %95, %97, %cst_28 {dimension_numbers = #tpu.dot_dimension_numbers<[1], [0], [0], [1], [0, 0, 1, 1], [], []>} : vector<8x32xbf16>, vector<32x32xbf16>, vector<8x32xf32> -> vector<8x32xf32>
    %99 = vector.extract_strided_slice %0 {offsets = [4, 0], sizes = [1, 32], strides = [1, 1]} : vector<6x32xf32> to vector<1x32xf32>
    %100 = vector.shape_cast %99 : vector<1x32xf32> to vector<32xf32>
    %101 = vector.extract_strided_slice %0 {offsets = [5, 0], sizes = [1, 32], strides = [1, 1]} : vector<6x32xf32> to vector<1x32xf32>
    %102 = vector.shape_cast %101 : vector<1x32xf32> to vector<32xf32>
    %cst_29 = arith.constant dense<0.000000e+00> : vector<8xf32>
    %103 = vector.multi_reduction <add>, %98, %cst_29 [1] : vector<8x32xf32> to vector<8xf32>
    %104 = vector.shape_cast %103 : vector<8xf32> to vector<8x1xf32>
    %cst_30 = arith.constant 3.200000e+01 : f32
    %105 = vector.broadcast %cst_30 : f32 to vector<8x1xf32>
    %106 = arith.divf %104, %105 : vector<8x1xf32>
    %107 = vector.broadcast %106 : vector<8x1xf32> to vector<8x32xf32>
    %108 = arith.subf %98, %107 : vector<8x32xf32>
    %109 = arith.mulf %108, %108 : vector<8x32xf32>
    %cst_31 = arith.constant dense<0.000000e+00> : vector<8xf32>
    %110 = vector.multi_reduction <add>, %109, %cst_31 [1] : vector<8x32xf32> to vector<8xf32>
    %111 = vector.shape_cast %110 : vector<8xf32> to vector<8x1xf32>
    %cst_32 = arith.constant 3.200000e+01 : f32
    %112 = vector.broadcast %cst_32 : f32 to vector<8x1xf32>
    %113 = arith.divf %111, %112 : vector<8x1xf32>
    %114 = vector.broadcast %106 : vector<8x1xf32> to vector<8x32xf32>
    %115 = arith.subf %98, %114 : vector<8x32xf32>
    %cst_33 = arith.constant 9.99999974E-6 : f32
    %116 = vector.broadcast %cst_33 : f32 to vector<8x1xf32>
    %117 = arith.addf %113, %116 : vector<8x1xf32>
    %118 = math.rsqrt %117 : vector<8x1xf32>
    %119 = vector.broadcast %118 : vector<8x1xf32> to vector<8x32xf32>
    %120 = arith.mulf %115, %119 : vector<8x32xf32>
    %121 = vector.shape_cast %100 : vector<32xf32> to vector<1x32xf32>
    %122 = vector.broadcast %121 : vector<1x32xf32> to vector<8x32xf32>
    %123 = arith.mulf %120, %122 : vector<8x32xf32>
    %124 = vector.shape_cast %102 : vector<32xf32> to vector<1x32xf32>
    %125 = vector.broadcast %124 : vector<1x32xf32> to vector<8x32xf32>
    %126 = arith.addf %123, %125 : vector<8x32xf32>
    %c0_34 = arith.constant 0 : index
    %c0_35 = arith.constant 0 : index
    %c0_36 = arith.constant 0 : index
    %127 = vector.load %arg7[%c0_34, %c0_35, %c0_36] : memref<1x8x32xf32, #tpu.memory_space<vmem>>, vector<1x8x32xf32>
    %128 = vector.shape_cast %127 : vector<1x8x32xf32> to vector<8x32xf32>
    %129 = vector.shape_cast %126 : vector<8x32xf32> to vector<1x8x32xf32>
    tpu.vector_store %arg7[%c0_34, %c0_35, %c0_36], %129 {strides = array<i32>} : memref<1x8x32xf32, #tpu.memory_space<vmem>>, vector<1x8x32xf32>,
    return
  }
  func.func @transform_0(%arg0: i32) -> (i32, i32, i32) {
    %c0_i32 = arith.constant 0 : i32
    %c0_i32_0 = arith.constant 0 : i32
    %c0_i32_1 = arith.constant 0 : i32
    return %arg0, %c0_i32, %c0_i32_0 : i32, i32, i32
  }
  func.func @transform_1(%arg0: i32) -> (i32, i32, i32) {
    %c0_i32 = arith.constant 0 : i32
    %c0_i32_0 = arith.constant 0 : i32
    %c0_i32_1 = arith.constant 0 : i32
    return %arg0, %c0_i32, %c0_i32_0 : i32, i32, i32
  }
  func.func @transform_2(%arg0: i32) -> (i32, i32) {
    %c0_i32 = arith.constant 0 : i32
    %c0_i32_0 = arith.constant 0 : i32
    %c0_i32_1 = arith.constant 0 : i32
    return %c0_i32, %c0_i32_0 : i32, i32
  }
  func.func @transform_3(%arg0: i32) -> (i32, i32) {
    %c0_i32 = arith.constant 0 : i32
    %c0_i32_0 = arith.constant 0 : i32
    %c0_i32_1 = arith.constant 0 : i32
    return %c0_i32, %c0_i32_0 : i32, i32
  }
  func.func @transform_4(%arg0: i32) -> (i32, i32) {
    %c0_i32 = arith.constant 0 : i32
    %c0_i32_0 = arith.constant 0 : i32
    %c0_i32_1 = arith.constant 0 : i32
    return %c0_i32, %c0_i32_0 : i32, i32
  }
  func.func @transform_5(%arg0: i32) -> (i32, i32) {
    %c0_i32 = arith.constant 0 : i32
    %c0_i32_0 = arith.constant 0 : i32
    %c0_i32_1 = arith.constant 0 : i32
    return %c0_i32, %c0_i32_0 : i32, i32
  }
  func.func @transform_6(%arg0: i32) -> (i32, i32, i32) {
    %c0_i32 = arith.constant 0 : i32
    %c0_i32_0 = arith.constant 0 : i32
    %c0_i32_1 = arith.constant 0 : i32
    return %arg0, %c0_i32, %c0_i32_0 : i32, i32, i32
  }
}

</mosaic_0001>

<bundles_post_ra>
// kernel: tpu_custom_call.1
= control target key start
LH: loop header
LB: loop body
LE: loop exit
PB: predicated region body
PF: predicated region fallthrough
CT: control target
= control target key end

     0   :  { %s3369_s0 = inlined_call_operand.hbm [shape: f32[2,16,32], index: 0, kind: input, shape index: {}]   ;;  %s3370_s1 = inlined_call_operand.hbm [shape: f32[2,8,32], index: 1, kind: input, shape index: {}]   ;;  %s3371_s2 = inlined_call_operand.hbm [shape: f32[6,32], index: 2, kind: input, shape index: {}]   ;;  %s3372_s3 = inlined_call_operand.hbm [shape: f32[32,32], index: 3, kind: input, shape index: {}]   ;;  %s3373_s4 = inlined_call_operand.hbm [shape: f32[32,64], index: 4, kind: input, shape index: {}]   ;;  %s3374_s5 = inlined_call_operand.hbm [shape: f32[32,32], index: 5, kind: input, shape index: {}]   ;;  %s3375_s6 = inlined_call_operand.hbm [shape: f32[2,8,32], index: 6, kind: output, shape index: {}]  }
   0x1   :  { %3378 = sst [smem:[#allocation21_spill]] %s3371_s2 }
   0x2   :  { %3379 = sst [smem:[#allocation22_spill]] %s3372_s3 }
   0x3   :  { %3380 = sst [smem:[#allocation23_spill]] %s3373_s4 }
   0x4   :  { %3381 = sst [smem:[#allocation24_spill]] %s3374_s5 }
   0x5   :  { %11 = vsyncpa [#allocation3], 0 }
   0x6   :  { %13 = vsyncpa [#allocation3 + $0x1], 0 }
   0x7   :  { %14 = vsyncpa [#allocation6], 0 }
   0x8   :  { %16 = vsyncpa [#allocation6 + $0x1], 0 }
   0x9   :  { %17 = vsyncpa [#allocation9], 0 }
   0xa   :  { %18 = vsyncpa [#allocation12], 0 }
   0xb   :  { %19 = vsyncpa [#allocation4], 0 }
   0xc   :  { %21 = vsyncpa [#allocation4 + $0x1], 0  ;;  %s2576_s21 = smov 0   ;;  %s2578_s22 = smov 0  }
   0xd   :  { %s2580_s23 = smov 0   ;;  %s2582_s24 = smov 0  }
   0xe LB: > { %s2597_s25 = sadd.s32 4294967295, %s2523_s24   ;;  %s2048_s26 = sadd.s32 4294967294, %s2523_s24   ;;  %s2523_s24 = sphi %s2582_s24, %s3400_s24   ;;  %s2519_s23 = sphi %s2580_s23, %s3399_s23   ;;  %s2515_s22 = sphi %s2578_s22, %s3398_s22   ;;  %s2511_s21 = sphi %s2576_s21, %s3397_s21  }
   0xf   : > { %p47_p0 = scmp.ne.s32.totalorder %s2515_s22, %s2511_s21  ;;  %p48_p1 = scmp.eq.s32.totalorder %s2597_s25, 0 }
  0x10   : > { %p181_p2 = scmp.eq.s32.totalorder %s2597_s25, 1  ;;  %p187_p3 = scmp.eq.s32.totalorder %s2048_s26, 1 }
  0x11   : > { %p2606_p4 = por %p48_p1, %p47_p0  ;;  %p2049_p5 = scmp.ge.s32.totalorder %s2523_s24, 1 }
  0x12   : > { %p2611_p6 = por %p187_p3, %p47_p0  ;;  %p194_p7 = scmp.lt.s32.totalorder %s2523_s24, 3 }
  0x13   : > { %s3384_s2 = sld [smem:[#allocation21_spill]]  ;;  %s2525_s9 = smov [#allocation7]  }
  0x14   : > { %p2619_p8 = pnand %p2049_p5, %p194_p7  ;;  %s208_s10 = sshll.u32 %s2525_s9, 4  ;;  %s209_s10 = int_to_ptr.vmem [resolvable:$true] %s208_s10 }
  0x15   : > { %s3386_s3 = sld [smem:[#allocation22_spill]]  ;;  %s2526_s15 = smov [#allocation8]  }
  0x16   : > { %p2107_p10 = pneg %p2619_p8  ;;  %s219_s16 = sshll.u32 %s2526_s15, 4  ;;  %s220_s16 = int_to_ptr.vmem [resolvable:$true] %s219_s16 }
  0x17   : > { %s3376_s17 = smov 128   ;;  %s3377_s18 = smov 8  }
  0x18   : > { %p2631_p11 = pnand %p2107_p10, %p48_p1  ;;  %s3388_s4 = sld [smem:[#allocation23_spill]] }
  0x19   : > { %s206_s7 = sshll.u32 %s3384_s2, 4  ;;  %s2529_s29 = smov [#allocation10]   ;;  %s207_s7 = int_to_ptr.hbm [resolvable:$true] %s206_s7 }
  0x1a   : > { %2110 = dma.hbm_to_vmem [thread:$0]  (!%p2631_p11), %s207_s7, 128, %s209_s10, [#allocation6]  }
  0x1b   : > { %s217_s13 = sshll.u32 %s3386_s3, 4  ;;  %s233_s30 = sshll.u32 %s2529_s29, 4  ;;  %s218_s13 = int_to_ptr.hbm [resolvable:$true] %s217_s13  ;;  %s234_s30 = int_to_ptr.vmem [resolvable:$true] %s233_s30 }
  0x1c   : > { %2113 = dma.hbm_to_vmem [thread:$0]  (!%p2631_p11), %s218_s13, 512, %s220_s16, [#allocation9], %s3376_s17, %s3376_s17, %s3377_s18  }
  0x1d   : > { %s3389_s5 = sld [smem:[#allocation24_spill]]  ;;  %s2530_s11 = smov [#allocation11]  }
  0x1e   : > { %s231_s26 = sshll.u32 %s3388_s4, 4  ;;  %s247_s12 = sshll.u32 %s2530_s11, 4  ;;  %s232_s26 = int_to_ptr.hbm [resolvable:$true] %s231_s26  ;;  %s248_s12 = int_to_ptr.vmem [resolvable:$true] %s247_s12 }
  0x1f   : > { %2116 = dma.hbm_to_vmem [thread:$0]  (!%p2631_p11), %s232_s26, 512, %s234_s30, [#allocation9], %s3376_s17, %s3376_s17, %s3377_s18  }
  0x20   : > { %s2659_s13 = sadd.s32 1, %s2523_s24   ;;  %s34_s15 = sadd.s32 1, %s2519_s23 }
  0x21   : > { %s31_s16 = ssub.s32 %s2523_s24, %s2659_s13  ;;  %p41_p12 = scmp.ne.s32.totalorder %s2519_s23, %s2515_s22 }
  0x22   : > { %p32_p13 = scmp.eq.s32.totalorder %s31_s16, 0  ;;  %p42_p0 = scmp.eq.s32.totalorder %s2523_s24, 0 }
  0x23   : > { %s245_s10 = sshll.u32 %s3389_s5, 4  ;;  %p2669_p3 = por %p181_p2, %p41_p12  ;;  %s246_s10 = int_to_ptr.hbm [resolvable:$true] %s245_s10 }
  0x24   : > { %2119 = dma.hbm_to_vmem [thread:$0]  (!%p2631_p11), %s246_s10, 512, %s248_s12, [#allocation12], %s3376_s17, %s3376_s17, %s3377_s18  }
  0x25   : > { %p2135_p5 = scmp.lt.s32.totalorder %s2523_s24, 2  ;;  %p43_p7 = por %p42_p0, %p41_p12 }
  0x26   : > { %s2675_s14 = scalar_select %p32_p13, %s2519_s23, %s34_s15  }
  0x27   : > { %s2678_s20 = sand.u32 1, %s2519_s23   ;;  %s2084_s29 = sshll.u32 %s2523_s24, 4 }
  0x28   : > { %3391 = sst [smem:[#allocation20_spill]] %s2675_s14  ;;  %s2055_s26 = sshll.u32 %s2678_s20, 4 }
  0x29   : > { %s270_s9 = scalar_lea.hbm %s3369_s0, %s2084_s29  ;;  %s265_s10 = scalar_lea.vmem [#allocation2], %s2055_s26 }
  0x2a   : > { %s273_s11 = sshll.u32 %s265_s10, 4  ;;  %s271_s12 = sshll.u32 %s270_s9, 4  ;;  %s274_s11 = int_to_ptr.vmem [resolvable:$true] %s273_s11  ;;  %s272_s12 = int_to_ptr.hbm [resolvable:$true] %s271_s12 }
  0x2b   : > { %p2685_p2 = pnand %p2135_p5, %p43_p7  ;;  %s283_s16 = sand.u32 1, %s2523_s24  }
  0x2c   : > { %s2058_s17 = sshll.u32 %s2678_s20, 3  ;;  %s262_s18 = scalar_lea.sflag [#allocation3], %s2678_s20 }
  0x2d   : > { %s2381_s2 = sshra.s32 %s272_s12, 4  ;;  %p2385_p11 = pneg %p2685_p2  ;;  %s2382_s2 = int_to_ptr.hbm [resolvable:$true] %s2381_s2 }
  0x2e   : > { %s2383_s3 = scalar_lea.hbm %s2382_s2, 16  ;;  %s2388_s30 = scalar_lea.hbm %s3369_s0, 32 }
  0x2f   : > { %p2384_p10 = scmp.ne.s32.totalorder %s2382_s2, %s2383_s3  ;;  %p2389_p0 = scmp.lt.s32.totalorder %s2382_s2, %s3369_s0 }
  0x30   : > { %p2390_p5 = scmp.lt.s32.totalorder %s2388_s30, %s2383_s3 }
  0x31   : > { %p2386_p12 = pnand %p2385_p11, %p2384_p10 }
  0x32   : > { %p2391_p7 = por %p2390_p5, %p2389_p0 }
  0x33   : > { %p2387_p13 = pneg %p2386_p12 }
  0x35   : > { %p2392_p9 = pnand %p2391_p7, %p2387_p13 }
  0x37   : > { %2395 = shalt.err (!%p2392_p9)
}
  0x38   : > { %s3393_s20 = smov 8   ;;  %s3394_s10 = smov 128  }
  0x39   : > { %2123 = dma.hbm_to_vmem [thread:$0]  (!%p2685_p2), %s272_s12, 256, %s274_s11, %s262_s18, %s3394_s10, %s3394_s10, %s3393_s20  }
  0x3a   : > { %s2059_s4 = sshll.u32 %s2523_s24, 3  ;;  %s287_s14 = scalar_lea.vmem [#allocation5], %s2058_s17 }
  0x3b   : > { %s291_s29 = scalar_lea.hbm %s3370_s1, %s2059_s4  ;;  %s295_s7 = sshll.u32 %s287_s14, 4  ;;  %s296_s7 = int_to_ptr.vmem [resolvable:$true] %s295_s7 }
  0x3c   : > { %s293_s2 = sshll.u32 %s291_s29, 4  ;;  %s284_s3 = scalar_lea.sflag [#allocation6], %s283_s16  ;;  %s294_s2 = int_to_ptr.hbm [resolvable:$true] %s293_s2 }
  0x3d   : > { %s2411_s30 = sshra.s32 %s294_s2, 4  ;;  %s2418_s12 = scalar_lea.hbm %s3370_s1, 16  ;;  %s2412_s30 = int_to_ptr.hbm [resolvable:$true] %s2411_s30 }
  0x3e   : > { %s2413_s9 = scalar_lea.hbm %s2412_s30, 8  ;;  %p2419_p13 = scmp.lt.s32.totalorder %s2412_s30, %s3370_s1 }
  0x3f   : > { %p2414_p9 = scmp.ne.s32.totalorder %s2412_s30, %s2413_s9  ;;  %p2420_p0 = scmp.lt.s32.totalorder %s2418_s12, %s2413_s9 }
  0x41   : > { %p2416_p10 = pnand %p2414_p9, %p2385_p11  ;;  %p2421_p5 = por %p2420_p0, %p2419_p13 }
  0x43   : > { %p2417_p12 = pneg %p2416_p10 }
  0x45   : > { %p2422_p7 = pnand %p2421_p5, %p2417_p12 }
  0x47   : > { %2425 = shalt.err (!%p2422_p7)
}
  0x48   : > { %2126 = dma.hbm_to_vmem [thread:$0]  (!%p2685_p2), %s294_s2, 128, %s296_s7, %s284_s3  }
  0x49   : > { %304 = sbr.rel (%p2619_p8) target bundleno = 1796 (0x704), region = 44  ;;  %s2726_s17 = sand.u32 (!%p2619_p8), 1, %s2515_s22  }
  0x4a   : > { %s2061_s14 = sshll.u32 (!%p2619_p8), %s2726_s17, 4  ;;  %s307_s16 = scalar_lea.sflag (!%p2619_p8), [#allocation3], %s2726_s17 }
  0x4b   : > { %s310_s20 = scalar_lea.vmem (!%p2619_p8), [#allocation2], %s2061_s14 }
  0x4e   : > { %2486 = dma.done.wait (%p2606_p4), %s307_s16, 256  }
  0x4f   : > { %2488 = vsyncadd (%p2606_p4), %s307_s16, 4294967040  ;;  %s316_s8 = sand.u32 1, %s2597_s25   ;;  %s2062_s15 = sshll.u32 %s2726_s17, 3 }
  0x50   : > { %s317_s10 = scalar_lea.sflag [#allocation6], %s316_s8  ;;  %s320_s26 = scalar_lea.vmem [#allocation5], %s2062_s15 }
  0x51   : > { %2490 = dma.done.wait (%p2606_p4), %s317_s10, 128  }
  0x52   : > { %2492 = vsyncadd (%p2606_p4), %s317_s10, 4294967168 }
  0x53   : > { %2494 = dma.done.wait (%p48_p1), [#allocation6], 128  }
  0x54   : > { %2496 = vsyncadd (%p48_p1), [#allocation6], 4294967168 }
  0x55   : > { %2498 = dma.done.wait (%p48_p1), [#allocation9], 1024  }
  0x56   : > { %2500 = vsyncadd (%p48_p1), [#allocation9], 4294966272 }
  0x57   : > { %2502 = dma.done.wait (%p48_p1), [#allocation12], 512  }
  0x58   : > { %2504 = vsyncadd (%p48_p1), [#allocation12], 4294966784  ;;  %vm379_vm0 = vcmask 261120   ;;  %v377_v0 = vld [vmem:[%s310_s20] sm:$0xff]  ;;  %v378_v4 = vld [vmem:[%s310_s20 + $0x8] sm:$0xff]  ;;  %v2531_v6 = vmov 32.0  }
  0x59   : > { %v437_v1 = vld [vmem:[%s320_s26] sm:$0xff]  ;;  %v380_v2 = vsel %vm379_vm0, %v377_v0, 0.0  ;;  %v383_v5 = vsel %vm379_vm0, %v378_v4, 0.0  ;;  %2234 = vrcp.f32 %v2531_v6  ;;  %v491_v29 = vld [vmem:[#allocation10 + $0x18] sm:$0xff]  ;;  %v488_v33 = vld [vmem:[#allocation10] sm:$0xff]  ;;  %s2532_s27 = smov 104  }
  0x5a   : > { %v438_v3 = vsel %vm379_vm0, %v437_v1, 0.0  ;;  %381 = vadd.xlane.f32.xlu0 %v380_v2  ;;  %v490_v28 = vld [vmem:[#allocation10 + $0x10] sm:$0xff]  ;;  %v489_v34 = vld [vmem:[#allocation10 + $0x8] sm:$0xff]  ;;  %v468_v38 = vld [vmem:[#allocation8 + $0x18] sm:$0xff]  ;;  %s2533_s29 = smov 112   ;;  %s2534_s7 = smov 120  }
  0x5b   : > { %439 = vadd.xlane.f32.xlu1 %v438_v3  ;;  %v493_v30 = vpack.c.bf16 %v491_v29, %v490_v28  ;;  %v492_v35 = vpack.c.bf16 %v489_v34, %v488_v33  ;;  %v467_v37 = vld [vmem:[#allocation8 + $0x10] sm:$0xff]  ;;  %v465_v40 = vld [vmem:[#allocation8] sm:$0xff]  ;;  %v466_v41 = vld [vmem:[#allocation8 + $0x8] sm:$0xff]  ;;  %s2535_s2 = smov 96   ;;  %v2536_v33 = vmov 1983009808  }
  0x5c   : > { %v470_v39 = vpack.c.bf16 %v468_v38, %v467_v37  ;;  %v469_v43 = vpack.c.bf16 %v466_v41, %v465_v40  ;;  %v376_v60 = vld [vmem:[#allocation7] sm:$0x3f]  ;;  %v531_v34 = vunpack.c.l.s4 %v2536_v33  ;;  %vm526_vm11 = vcmask 1047556   ;;  %s2538_s3 = smov 16   ;;  %s2539_s30 = smov 24  }
  0x5d   : > { %503 = vmatpush.bf16.msra.mxu1 %v493_v30  ;;  %vm1386_vm12 = vcmask 64512   ;;  %vm1624_vm13 = vcmask 1043456   ;;  %vm1499_vm14 = vcmask 195584   ;;  %s2540_s9 = smov 8   ;;  %s2081_s18 = sshll.u32 %s2597_s25, 3 }
  0x5e   : > { %480 = vmatpush.bf16.msra.mxu0 %v470_v39  ;;  %v2788_v37 = vunpack.c.0.s8 %v531_v34  ;;  %s1912_s5 = scalar_lea.hbm %s3375_s6, %s2081_s18  ;;  %s374_s4 = scalar_lea.vmem [#allocation13], %s2062_s15 }
  0x5f   : > { %v2235_v7 = vpop.eup %2234  ;;  %s1914_s14 = sshll.u32 %s374_s4, 4  ;;  %s1916_s16 = sshll.u32 %s1912_s5, 4  ;;  %s1915_s14 = int_to_ptr.vmem [resolvable:$true] %s1914_s14  ;;  %s1917_s16 = int_to_ptr.hbm [resolvable:$true] %s1916_s16 }
  0x60   : > { %v387_v8 = vmul.f32 32.0, %v2235_v7  ;;  %vm391_vm1 = vweird.f32 %v2235_v7  ;;  %s1902_s25 = scalar_lea.sflag [#allocation4], %s2726_s17  ;;  %s2455_s20 = sshra.s32 %s1917_s16, 4  ;;  %s2456_s20 = int_to_ptr.hbm [resolvable:$true] %s2455_s20 }
  0x61   : > { %504 = vmatpush.bf16.msra.mxu1 %v492_v35  ;;  %s2457_s8 = scalar_lea.hbm %s2456_s20, 8  ;;  %s2461_s15 = scalar_lea.hbm %s3375_s6, 16 }
  0x62   : > { %384 = vadd.xlane.f32.xlu0 %v383_v5  ;;  %v388_v9 = vsub.f32 1.0, %v387_v8  ;;  %481 = vmatpush.bf16.msra.mxu0 %v469_v43  ;;  %p2458_p1 = scmp.ne.s32.totalorder %s2456_s20, %s2457_s8  ;;  %p2462_p2 = scmp.lt.s32.totalorder %s2456_s20, %s3375_s6 }
  0x63   : > { %p2463_p11 = scmp.lt.s32.totalorder %s2461_s15, %s2457_s8 }
  0x64   : > { %v389_v10 = vmul.f32 %v2235_v7, %v388_v9  ;;  %p2459_p4 = pnand %p2458_p1, %p2669_p3 }
  0x65   : > { %p2464_p9 = por %p2463_p11, %p2462_p2 }
  0x66   : > { %v390_v11 = vadd.f32 %v2235_v7, %v389_v10  ;;  %p2460_p8 = pneg %p2459_p4 }
  0x68   : > { %v2757_v12 = vsel %vm391_vm1, %v2235_v7, %v390_v11  ;;  %v434_v7 = vperm.slane %v376_v60, 1  ;;  %p2465_p10 = pnand %p2464_p9, %p2460_p8 }
  0xcd   : > { %v382_v13 = vpop.xlane.xlu0 %381 }
  0xce   : > { %v393_v14 = vmul.f32 %v2757_v12, %v382_v13  ;;  %v440_v17 = vpop.xlane.xlu1 %439 }
  0xcf   : > { %v441_v21 = vmul.f32 %v440_v17, %v2757_v12 }
  0xd0   : > { %v395_v15 = vsub.f32 %v377_v0, %v393_v14  ;;  %v431_v0 = vperm.slane %v376_v60, 0 }
  0xd1   : > { %v2763_v23 = vsub.f32 %v437_v1, %v441_v21 }
  0xd2   : > { %v397_v16 = vmul.f32 %v395_v15, %v395_v15 }
  0xd3   : > { %v443_v26 = vmul.f32 %v2763_v23, %v2763_v23 }
  0xd4   : > { %v399_v18 = vsel %vm379_vm0, %v397_v16, 0.0  ;;  %v460_v16 = vperm.slane %v376_v60, 2 }
  0xd5   : > { %400 = vadd.xlane.f32.xlu1 %v399_v18  ;;  %v385_v19 = vpop.xlane.xlu0 %384  ;;  %v444_v27 = vsel %vm379_vm0, %v443_v26, 0.0 }
  0xd6   : > { %v394_v20 = vmul.f32 %v2757_v12, %v385_v19  ;;  %v462_v19 = vperm.slane %v376_v60, 3 }
  0xd8   : > { %v396_v22 = vsub.f32 %v378_v4, %v394_v20 }
  0xda   : > { %v398_v24 = vmul.f32 %v396_v22, %v396_v22 }
  0xdc   : > { %v402_v25 = vsel %vm379_vm0, %v398_v24, 0.0 }
  0xdd   : > { %403 = vadd.xlane.f32.xlu2 %v402_v25 }
  0xe5   : > { %445 = vadd.xlane.f32.xlu2 %v444_v27 }
 0x148   : > { %v401_v31 = vpop.xlane.xlu1 %400 }
 0x149   : > { %v405_v32 = vmul.f32 %v401_v31, %v2757_v12 }
 0x14b   : > { %v407_v36 = vadd.f32 1e-05, %v405_v32 }
 0x14d   : > { %2236 = vrsqrt.f32 %v407_v36  ;;  %vm415_vm3 = vweird.f32 %v407_v36 }
 0x150   : > { %v404_v42 = vpop.xlane.xlu2 %403 }
 0x151   : > { %v406_v44 = vmul.f32 %v404_v42, %v2757_v12 }
 0x153   : > { %v2237_v45 = vpop.eup %2236  ;;  %v408_v46 = vadd.f32 1e-05, %v406_v44  ;;  %v2537_v44 = vmov 1934713408  }
 0x154   : > { %v410_v47 = vmul.f32 %v2237_v45, %v407_v36  ;;  %vm416_vm2 = vweird.f32 %v2237_v45 }
 0x155   : > { %2238 = vrsqrt.f32 %v408_v46  ;;  %vm417_vm4 = vmor %vm415_vm3, %vm416_vm2  ;;  %vm425_vm6 = vweird.f32 %v408_v46 }
 0x156   : > { %v411_v48 = vmul.f32 %v2237_v45, %v410_v47 }
 0x158   : > { %v412_v49 = vmul.f32 0.5, %v411_v48  ;;  %v446_v50 = vpop.xlane.xlu2 %445 }
 0x159   : > { %v447_v51 = vmul.f32 %v446_v50, %v2757_v12 }
 0x15a   : > { %v413_v52 = vsub.f32 1.5, %v412_v49 }
 0x15b   : > { %v2239_v53 = vpop.eup %2238  ;;  %v448_v54 = vadd.f32 1e-05, %v447_v51 }
 0x15c   : > { %v414_v55 = vmul.f32 %v2237_v45, %v413_v52  ;;  %v420_v56 = vmul.f32 %v2239_v53, %v408_v46  ;;  %vm426_vm5 = vweird.f32 %v2239_v53 }
 0x15d   : > { %2240 = vrsqrt.f32 %v448_v54  ;;  %vm427_vm7 = vmor %vm425_vm6, %vm426_vm5  ;;  %vm455_vm8 = vweird.f32 %v448_v54 }
 0x15e   : > { %v421_v57 = vmul.f32 %v2239_v53, %v420_v56  ;;  %v418_v58 = vsel %vm417_vm4, %v2237_v45, %v414_v55  ;;  %v555_v45 = vunpack.c.l.s4 %v2537_v44 }
 0x15f   : > { %v429_v63 = vmul.f32 %v418_v58, %v395_v15 }
 0x160   : > { %v422_v59 = vmul.f32 0.5, %v421_v57  ;;  %v2806_v58 = vunpack.c.0.s8 %v555_v45 }
 0x161   : > { %v432_v6 = vmul.f32 %v431_v0, %v429_v63 }
 0x162   : > { %v423_v61 = vsub.f32 1.5, %v422_v59 }
 0x163   : > { %v2241_v62 = vpop.eup %2240  ;;  %v435_v11 = vadd.f32 %v434_v7, %v432_v6 }
 0x164   : > { %v424_v1 = vmul.f32 %v2239_v53, %v423_v61  ;;  %v450_v2 = vmul.f32 %v2241_v62, %v448_v54  ;;  %vm456_vm9 = vweird.f32 %v2241_v62 }
 0x165   : > { %vm457_vm10 = vmor %vm455_vm8, %vm456_vm9 }
 0x166   : > { %v428_v3 = vsel %vm427_vm7, %v2239_v53, %v424_v1  ;;  %v451_v4 = vmul.f32 %v2241_v62, %v450_v2 }
 0x167   : > { %v430_v5 = vmul.f32 %v428_v3, %v396_v22 }
 0x168   : > { %v452_v8 = vmul.f32 0.5, %v451_v4 }
 0x169   : > { %v433_v9 = vmul.f32 %v431_v0, %v430_v5 }
 0x16a   : > { %v453_v10 = vsub.f32 1.5, %v452_v8 }
 0x16b   : > { %v436_v13 = vadd.f32 %v434_v7, %v433_v9 }
 0x16c   : > { %v454_v14 = vmul.f32 %v2241_v62, %v453_v10 }
 0x16d   : > { %v487_v15 = vpack.c.bf16 %v436_v13, %v435_v11 }
 0x16e   : > { %v458_v17 = vsel %vm457_vm10, %v2241_v62, %v454_v14 }
 0x16f   : > { %2069 = vmatmul.msk.bf16.vlgmr.msra.gmra.mxu1 %vm379_vm0, %v487_v15  ;;  %v459_v18 = vmul.f32 %v458_v17, %v2763_v23 }
 0x171   : > { %v461_v20 = vmul.f32 %v460_v16, %v459_v18 }
 0x173   : > { %v463_v21 = vadd.f32 %v462_v19, %v461_v20 }
 0x175   : > { %v464_v22 = vpack.c.bf16 %v463_v21, %v463_v21 }
 0x177   : > { %2068 = vmatmul.msk.bf16.vlgmr.msra.gmra.mxu0 %vm379_vm0, %v464_v22 }
 0x17f   : > { %2070 = vmatmul.msk.bf16.gmra.mxu1 %vm379_vm0, %v464_v22 }
 0x1ec   : > { %v2776_v24 = vpop.f32.mrf.mxu1 }
 0x1ed   : > { %v668_v57 = vrot.slane %v2776_v24, 4 }
 0x1f4   : > { %v483_v25 = vpop.f32.mrf.mxu0  ;;  %v508_v26 = vpop.f32.mrf.mxu1 }
 0x1f5   : > { %v2199_v30 = vpack.i.bf16 %v508_v26, %v2776_v24  ;;  %v724_v36 = vrot.slane %v508_v26, 4  ;;  %v528_v43 = vrot.slane %v483_v25, 4 }
 0x1fc   : > { %v485_v27 = vpop.f32.mrf.mxu0  ;;  %v2778_v28 = vpop.f32.mrf.mxu1 }
 0x1fd   : > { %661 = vrot.lane.b32.xlu2 %v2778_v28, %s2532_s27  ;;  %v2194_v23 = vpack.i.bf16 %v2776_v24, %v2778_v28  ;;  %v780_v49 = vrot.slane %v2778_v28, 4 }
 0x1ff   : > { %2195 = vrot.lane.b32.xlu1 %v2194_v23, %s2533_s29  ;;  %2190 = vrot.lane.b32.xlu0 %v2194_v23, %s2534_s7 }
 0x204   : > { %v513_v29 = vpop.f32.mrf.mxu1 }
 0x205   : > { %650 = vrot.lane.b32.xlu2 %v508_v26, %s2533_s29 }
 0x207   : > { %2200 = vrot.lane.b32.xlu1 %v2199_v30, %s2532_s27  ;;  %641 = vrot.lane.b32.xlu0 %v508_v26, %s2534_s7 }
 0x20d   : > { %519 = vrot.lane.b32.xlu2 %v483_v25, %s2533_s29 }
 0x20f   : > { %522 = vrot.lane.b32.xlu1 %v483_v25, %s2532_s27  ;;  %516 = vrot.lane.b32.xlu0 %v483_v25, %s2534_s7 }
 0x217   : > { %2205 = vrot.lane.b32.xlu0 %v2199_v30, %s2535_s2 }
 0x257   : > { %v662_v31 = vpop.permute.xlu2 %661 }
 0x258   : > { %v790_v55 = vrot.slane %v662_v31, 4 }
 0x25f   : > { %v2785_v32 = vpop.permute.xlu2 %650 }
 0x260   : > { %v722_v35 = vrot.slane %v2785_v32, 4  ;;  %v725_v39 = vsel %vm526_vm11, %v2785_v32, %v724_v36 }
 0x261   : > { %v2794_v42 = vperm.slane %v725_v39, %v2788_v37 }
 0x262   : > { %v723_v40 = vsel %vm526_vm11, %v722_v35, %v508_v26 }
 0x263   : > { %v2797_v46 = vperm.slane %v723_v40, %v2788_v37  ;;  %v760_v56 = vrot.slane %v2794_v42, 4 }
 0x265   : > { %v748_v59 = vrot.slane %v2797_v46, 4 }
 0x267   : > { %v520_v38 = vpop.permute.xlu2 %519 }
 0x268   : > { %v525_v41 = vrot.slane %v520_v38, 4  ;;  %v529_v47 = vsel %vm526_vm11, %v520_v38, %v528_v43 }
 0x269   : > { %v2815_v0 = vperm.slane %v529_v47, %v2788_v37 }
 0x26a   : > { %v527_v51 = vsel %vm526_vm11, %v525_v41, %v483_v25 }
 0x26b   : > { %v2812_v63 = vperm.slane %v527_v51, %v2788_v37  ;;  %v564_v16 = vrot.slane %v2815_v0, 4 }
 0x26d   : > { %v552_v40 = vrot.slane %v2812_v63, 4 }
 0x271   : > { %v2196_v48 = vpop.permute.xlu1 %2195  ;;  %v2191_v50 = vpop.permute.xlu0 %2190 }
 0x272   : > { %v2802_v52 = vunpack.i.h.bf16 %v2196_v48  ;;  %v2197_v53 = vunpack.i.l.bf16 %v2196_v48  ;;  %v2192_v54 = vunpack.i.l.bf16 %v2191_v50  ;;  %v2827_v10 = vunpack.i.h.bf16 %v2191_v50 }
 0x274   : > { %v666_v60 = vrot.slane %v2802_v52, 4  ;;  %v778_v61 = vrot.slane %v2197_v53, 4  ;;  %v781_v62 = vsel %vm526_vm11, %v2197_v53, %v780_v49  ;;  %v791_v2 = vsel %vm526_vm11, %v790_v55, %v2192_v54 }
 0x275   : > { %v789_v1 = vperm.slane %v781_v62, %v2788_v37  ;;  %v792_v5 = vrot.slane %v2192_v54, 4  ;;  %v797_v6 = vperm.slane %v791_v2, %v2788_v37  ;;  %v669_v7 = vsel %vm526_vm11, %v2802_v52, %v668_v57 }
 0x276   : > { %v667_v3 = vsel %vm526_vm11, %v666_v60, %v2776_v24  ;;  %v779_v4 = vsel %vm526_vm11, %v778_v61, %v2778_v28  ;;  %v2214_v14 = vpack.i.bf16 %v662_v31, %v2197_v53  ;;  %v2209_v15 = vpack.i.bf16 %v2192_v54, %v2778_v28 }
 0x277   : > { %v785_v8 = vperm.slane %v779_v4, %v2788_v37  ;;  %v816_v9 = vrot.slane %v789_v1, 4  ;;  %v793_v11 = vsel %vm526_vm11, %v662_v31, %v792_v5  ;;  %v802_v13 = vrot.slane %v797_v6, 4 }
 0x278   : > { %v2833_v17 = vperm.slane %v667_v3, %v2788_v37  ;;  %v801_v19 = vperm.slane %v793_v11, %v2788_v37  ;;  %2215 = vrot.lane.b32.xlu1 %v2214_v14, %s2535_s2  ;;  %2210 = vrot.lane.b32.xlu2 %v2209_v15, %s2535_s2  ;;  %v677_v27 = vperm.slane %v669_v7, %v2788_v37  ;;  %v680_v28 = vrot.slane %v2827_v10, 4 }
 0x279   : > { %v804_v18 = vrot.slane %v785_v8, 4  ;;  %v2836_v20 = vpop.permute.xlu1 %2200  ;;  %v2838_v21 = vpop.permute.xlu0 %641  ;;  %v803_v22 = vsel %vm526_vm11, %v802_v13, %v785_v8 }
 0x27a   : > { %v2203_v24 = vunpack.i.h.bf16 %v2836_v20  ;;  %v2202_v25 = vunpack.i.l.bf16 %v2836_v20  ;;  %v736_v26 = vrot.slane %v2838_v21, 4  ;;  %v817_v29 = vsel %vm526_vm11, %v801_v19, %v816_v9 }
 0x27b   : > { %v805_v23 = vsel %vm526_vm11, %v797_v6, %v804_v18  ;;  %v825_v31 = vperm.slane %v817_v29, %v2806_v58  ;;  %v2853_v35 = vperm.slane %v803_v22, %v2806_v58  ;;  %v814_v36 = vrot.slane %v801_v19, 4 }
 0x27c   : > { %v813_v30 = vperm.slane %v805_v23, %v2806_v58  ;;  %v734_v33 = vrot.slane %v2203_v24, 4  ;;  %v678_v34 = vrot.slane %v2202_v25, 4  ;;  %v681_v38 = vsel %vm526_vm11, %v2202_v25, %v680_v28 }
 0x27d   : > { %v737_v39 = vsel %vm526_vm11, %v2203_v24, %v736_v26  ;;  %v692_v41 = vrot.slane %v2833_v17, 4  ;;  %v689_v47 = vperm.slane %v681_v38, %v2788_v37  ;;  %v704_v50 = vrot.slane %v677_v27, 4 }
 0x27e   : > { %v2859_v43 = vrot.slane %v813_v30, 4  ;;  %v679_v44 = vsel %vm526_vm11, %v678_v34, %v2827_v10  ;;  %v735_v48 = vsel %vm526_vm11, %v734_v33, %v2838_v21  ;;  %v745_v49 = vperm.slane %v737_v39, %v2788_v37 }
 0x27f   : > { %v685_v45 = vperm.slane %v679_v44, %v2788_v37  ;;  %v2868_v51 = vrot.slane %v825_v31, 4  ;;  %v741_v53 = vperm.slane %v735_v48, %v2788_v37  ;;  %v2219_v54 = vpack.i.bf16 %v2838_v21, %v2827_v10 }
 0x280   : > { %v815_v55 = vsel %vm526_vm11, %v814_v36, %v789_v1  ;;  %v826_v57 = vrot.slane %v2853_v35, 4  ;;  %v2877_v60 = vsel %vm526_vm11, 0.0, %v2859_v43  ;;  %v702_v2 = vrot.slane %v689_v47, 4 }
 0x281   : > { %v693_v61 = vsel %vm526_vm11, %v685_v45, %v692_v41  ;;  %v705_v3 = vsel %vm526_vm11, %v689_v47, %v704_v50  ;;  %v746_v4 = vrot.slane %v741_v53, 4  ;;  %v690_v5 = vrot.slane %v685_v45, 4  ;;  %v523_v8 = vpop.permute.xlu1 %522  ;;  %v517_v29 = vpop.permute.xlu0 %516 }
 0x282   : > { %v701_v62 = vperm.slane %v693_v61, %v2806_v58  ;;  %v713_v6 = vperm.slane %v705_v3, %v2806_v58  ;;  %v749_v1 = vsel %vm526_vm11, %v741_v53, %v748_v59  ;;  %v758_v7 = vrot.slane %v745_v49, 4 }
 0x283   : > { %v2888_v9 = vsel %vm526_vm11, 0.0, %v2868_v51  ;;  %v703_v11 = vsel %vm526_vm11, %v702_v2, %v677_v27  ;;  %v747_v14 = vsel %vm526_vm11, %v746_v4, %v2797_v46  ;;  %v757_v59 = vperm.slane %v749_v1, %v2806_v58 }
 0x284   : > { %v2891_v13 = vrot.slane %v701_v62, 4  ;;  %v709_v15 = vperm.slane %v703_v11, %v2806_v58  ;;  %v720_v18 = vrot.slane %v713_v6, 4  ;;  %v753_v19 = vperm.slane %v747_v14, %v2806_v58 }
 0x285   : > { %v821_v22 = vperm.slane %v815_v55, %v2806_v58  ;;  %v759_v24 = vsel %vm526_vm11, %v758_v7, %v2794_v42  ;;  %v761_v25 = vsel %vm526_vm11, %v745_v49, %v760_v56  ;;  %v538_v26 = vrot.slane %v523_v8, 4 }
 0x286   : > { %v947_v27 = vrot.slane %v2877_v60, 4  ;;  %v958_v46 = vrot.slane %v2888_v9, 4  ;;  %v691_v28 = vsel %vm526_vm11, %v690_v5, %v2833_v17  ;;  %v2910_v23 = vsel %vm526_vm11, 0.0, %v2891_v13 }
 0x287   : > { %v718_v30 = vrot.slane %v709_v15, 4  ;;  %v845_v31 = vsel %vm526_vm11, %v720_v18, %v709_v15  ;;  %v2914_v42 = vperm.slane %v759_v24, %v2806_v58  ;;  %v769_v56 = vperm.slane %v761_v25, %v2806_v58 }
 0x288   : > { %v2918_v33 = vsel %vm526_vm11, 0.0, %v720_v18  ;;  %v770_v34 = vrot.slane %v753_v19, 4  ;;  %v772_v36 = vrot.slane %v757_v59, 4  ;;  %v539_v17 = vsel %vm526_vm11, %v538_v26, %v517_v29 }
 0x289   : > { %v2922_v38 = vperm.slane %v691_v28, %v2806_v58  ;;  %v776_v39 = vrot.slane %v769_v56, 4  ;;  %v540_v41 = vrot.slane %v517_v29, 4  ;;  %v545_v44 = vperm.slane %v539_v17, %v2788_v37 }
 0x28a   : > { %v839_v45 = vrot.slane %v2910_v23, 4  ;;  %v2927_v47 = vperm.slane %v845_v31, %v2788_v37  ;;  %v2930_v48 = vsel %vm526_vm11, 0.0, %v772_v36  ;;  %v888_v49 = vsel %vm526_vm11, %v772_v36, %v753_v19 }
 0x28b   : > { %v719_v50 = vsel %vm526_vm11, 0.0, %v718_v30  ;;  %v850_v53 = vrot.slane %v2918_v33, 4  ;;  %v2936_v55 = vsel %vm526_vm11, 0.0, %v770_v34  ;;  %v774_v60 = vrot.slane %v2914_v42, 4 }
 0x28c   : > { %v2940_v61 = vsel %vm526_vm11, 0.0, %v776_v39  ;;  %v541_v62 = vsel %vm526_vm11, %v523_v8, %v540_v41  ;;  %v550_v2 = vrot.slane %v545_v44, 4  ;;  %v553_v3 = vsel %vm526_vm11, %v545_v44, %v552_v40 }
 0x28d   : > { %v2947_v4 = vperm.slane %v888_v49, %v2788_v37  ;;  %v893_v5 = vrot.slane %v2930_v48, 4  ;;  %v549_v6 = vperm.slane %v541_v62, %v2788_v37  ;;  %v561_v1 = vperm.slane %v553_v3, %v2806_v58 }
 0x28e   : > { %v2954_v7 = vsel %vm526_vm11, %v776_v39, %v2914_v42  ;;  %v551_v8 = vsel %vm526_vm11, %v550_v2, %v2812_v63  ;;  %v830_v9 = vrot.slane %v821_v22, 4  ;;  %v942_v40 = vsel %vm526_vm11, %v2859_v43, %v2853_v35 }
 0x28f   : > { %v557_v11 = vperm.slane %v551_v8, %v2806_v58  ;;  %v562_v14 = vrot.slane %v549_v6, 4  ;;  %v565_v15 = vsel %vm526_vm11, %v549_v6, %v564_v16  ;;  %v576_v18 = vrot.slane %v561_v1, 4 }
 0x290   : > { %v573_v19 = vperm.slane %v565_v15, %v2806_v58  ;;  %v827_v59 = vsel %vm526_vm11, 0.0, %v826_v57  ;;  %v831_v63 = vsel %vm526_vm11, 0.0, %v830_v9  ;;  %v946_v24 = vperm.slane %v942_v40, %v2788_v37 }
 0x291   : > { %v563_v43 = vsel %vm526_vm11, %v562_v14, %v2815_v0  ;;  %v574_v25 = vrot.slane %v557_v11, 4  ;;  %v577_v26 = vsel %vm526_vm11, 0.0, %v576_v18  ;;  %v582_v28 = vsel %vm526_vm11, %v576_v18, %v557_v11 }
 0x292   : > { %v569_v16 = vperm.slane %v563_v43, %v2806_v58  ;;  %v580_v29 = vrot.slane %v573_v19, 4  ;;  %v2977_v30 = vperm.slane %v582_v28, %v2788_v37  ;;  %v587_v35 = vrot.slane %v577_v26, 4 }
 0x293   : > { %v575_v57 = vsel %vm526_vm11, 0.0, %v574_v25  ;;  %v948_v31 = vsel %vm526_vm11, %v947_v27, %v827_v59  ;;  %v953_v42 = vsel %vm526_vm11, %v2868_v51, %v821_v22  ;;  %v959_v0 = vsel %vm526_vm11, %v958_v46, %v831_v63 }
 0x294   : > { %v578_v56 = vrot.slane %v569_v16, 4  ;;  %v581_v33 = vsel %vm526_vm11, 0.0, %v580_v29  ;;  %v588_v34 = vsel %vm526_vm11, %v587_v35, %v575_v57  ;;  %v593_v36 = vsel %vm526_vm11, %v580_v29, %v569_v16 }
 0x295   : > { %v904_v17 = vrot.slane %v2940_v61, 4  ;;  %v2989_v39 = vperm.slane %v588_v34, %v2788_v37  ;;  %v2992_v41 = vperm.slane %v593_v36, %v2788_v37  ;;  %v598_v27 = vrot.slane %v581_v33, 4 }
 0x296   : > { %v579_v51 = vsel %vm526_vm11, 0.0, %v578_v56  ;;  %v952_v22 = vperm.slane %v948_v31, %v2788_v37  ;;  %v957_v46 = vperm.slane %v953_v42, %v2788_v37  ;;  %v963_v44 = vperm.slane %v959_v0, %v2788_v37 }
 0x297   : > { %v2999_v49 = vsel %vm526_vm11, %v598_v27, %v579_v51  ;;  %v606_v61 = vrot.slane %v2977_v30, 4  ;;  %v966_v62 = vrot.slane %v946_v24, 4  ;;  %v714_v2 = vrot.slane %v2922_v38, 4 }
 0x298   : > { %v978_v3 = vrot.slane %v957_v46, 4  ;;  %v964_v6 = vrot.slane %v952_v22, 4  ;;  %v976_v1 = vrot.slane %v963_v44, 4  ;;  %v775_v8 = vsel %vm526_vm11, 0.0, %v774_v60 }
 0x299   : > { %v967_v9 = vsel %vm526_vm11, %v952_v22, %v966_v62  ;;  %v715_v40 = vsel %vm526_vm11, 0.0, %v714_v2  ;;  %v834_v11 = vsel %vm526_vm11, %v2891_v13, %v2922_v38  ;;  %v851_v14 = vsel %vm526_vm11, %v850_v53, %v719_v50 }
 0x29a   : > { %v3011_v15 = vperm.slane %v967_v9, %v2806_v58  ;;  %v979_v18 = vsel %vm526_vm11, %v963_v44, %v978_v3  ;;  %v965_v19 = vsel %vm526_vm11, %v964_v6, %v946_v24  ;;  %v977_v59 = vsel %vm526_vm11, %v976_v1, %v957_v46 }
 0x29b   : > { %v3017_v60 = vperm.slane %v979_v18, %v2806_v58  ;;  %v971_v63 = vperm.slane %v965_v19, %v2806_v58  ;;  %v983_v43 = vperm.slane %v977_v59, %v2806_v58  ;;  %v838_v13 = vperm.slane %v834_v11, %v2788_v37 }
 0x29c   : > { %v840_v38 = vsel %vm526_vm11, %v839_v45, %v715_v40  ;;  %v855_v50 = vperm.slane %v851_v14, %v2788_v37  ;;  %v870_v53 = vrot.slane %v2927_v47, 4  ;;  %v894_v24 = vsel %vm526_vm11, %v893_v5, %v2936_v55 }
 0x29d   : > { %v992_v25 = vrot.slane %v3017_v60, 4  ;;  %v988_v26 = vrot.slane %v983_v43, 4  ;;  %v990_v28 = vrot.slane %v971_v63, 4  ;;  %v844_v16 = vperm.slane %v840_v38, %v2788_v37 }
 0x29e   : > { %v858_v29 = vrot.slane %v838_v13, 4  ;;  %v871_v23 = vsel %vm526_vm11, %v855_v50, %v870_v53  ;;  %v898_v45 = vperm.slane %v894_v24, %v2788_v37  ;;  %v903_v35 = vperm.slane %v2954_v7, %v2788_v37 }
 0x29f   : > { %v993_v57 = vsel %vm526_vm11, %v992_v25, %v3011_v15  ;;  %v989_v48 = vsel %vm526_vm11, %v988_v26, %v971_v63  ;;  %v991_v55 = vsel %vm526_vm11, %v983_v43, %v990_v28  ;;  %v3042_v5 = vperm.slane %v871_v23, %v2806_v58 }
 0x2a0   : > { %v1374_v31 = vpack.c.bf16 %v993_v57, %v993_v57  ;;  %v1368_v42 = vpack.c.bf16 %v989_v48, %v989_v48  ;;  %v1371_v0 = vpack.c.bf16 %v991_v55, %v991_v55  ;;  %v859_v56 = vsel %vm526_vm11, %v844_v16, %v858_v29 }
 0x2a1   : > { %v3046_v33 = vperm.slane %v859_v56, %v2806_v58  ;;  %v884_v7 = vrot.slane %v3042_v5, 4  ;;  %v905_v34 = vsel %vm526_vm11, %v904_v17, %v775_v8  ;;  %v912_v36 = vrot.slane %v2947_v4, 4 }
 0x2a2   : > { %v1444_v27 = vunpack.c.l.b16 %v1374_v31  ;;  %v1383_v51 = vunpack.c.l.b16 %v1368_v42  ;;  %v1414_v22 = vunpack.c.l.b16 %v1371_v0  ;;  %v909_v46 = vperm.slane %v905_v34, %v2788_v37 }
 0x2a3   : > { %v885_v44 = vsel %vm526_vm11, %v884_v7, %v3046_v33  ;;  %v913_v62 = vsel %vm526_vm11, %v898_v45, %v912_v36  ;;  %v924_v2 = vrot.slane %v903_v35, 4  ;;  %v856_v3 = vrot.slane %v844_v16, 4 }
 0x2a4   : > { %v1446_v6 = vpack.c.b16 %v1444_v27, %v1444_v27  ;;  %v1385_v1 = vpack.c.b16 %v1383_v51, %v1383_v51  ;;  %v1416_v9 = vpack.c.b16 %v1414_v22, %v1414_v22  ;;  %v3056_v40 = vperm.slane %v913_v62, %v2806_v58 }
 0x2a5   : > { %v925_v17 = vsel %vm526_vm11, %v909_v46, %v924_v2  ;;  %v1372_v8 = vpack.c.bf16 %v885_v44, %v885_v44  ;;  %v857_v11 = vsel %vm526_vm11, %v856_v3, %v838_v13  ;;  %v868_v14 = vrot.slane %v855_v50, 4 }
 0x2a6   : > { %v1454_v18 = vsel %vm1386_vm12, %v1446_v6, 0  ;;  %v1394_v19 = vsel %vm1386_vm12, %v1385_v1, 0  ;;  %v1424_v59 = vsel %vm1386_vm12, %v1416_v9, 0  ;;  %v3064_v63 = vperm.slane %v925_v17, %v2806_v58 }
 0x2a7   : > { %1462 = vmatpush.bf16.xpose.msrb.mxu0 %v1454_v18  ;;  %1402 = vmatpush.bf16.xpose.msra.mxu2 %v1394_v19  ;;  %v1442_v43 = vunpack.c.l.b16 %v1372_v8  ;;  %v863_v38 = vperm.slane %v857_v11, %v2806_v58  ;;  %v869_v53 = vsel %vm526_vm11, %v868_v14, %v2927_v47  ;;  %v910_v24 = vrot.slane %v898_v45, 4 }
 0x2a8   : > { %1432 = vmatpush.bf16.xpose.msra.mxu3 %v1424_v59  ;;  %v938_v13 = vrot.slane %v3064_v63, 4  ;;  %v875_v50 = vperm.slane %v869_v53, %v2806_v58  ;;  %v922_v25 = vrot.slane %v909_v46, 4  ;;  %v994_v26 = vrot.slane %v3011_v15, 4 }
 0x2a9   : > { %v911_v28 = vsel %vm526_vm11, %v910_v24, %v2947_v4  ;;  %v882_v16 = vrot.slane %v863_v38, 4  ;;  %v603_v29 = vperm.slane %v2999_v49, %v2788_v37  ;;  %v607_v47 = vsel %vm526_vm11, %v2989_v39, %v606_v61 }
 0x2aa   : > { %v939_v23 = vsel %vm526_vm11, %v938_v13, %v3056_v40  ;;  %v880_v45 = vrot.slane %v875_v50, 4  ;;  %v917_v57 = vperm.slane %v911_v28, %v2806_v58  ;;  %v923_v15 = vsel %vm526_vm11, %v922_v25, %v903_v35 }
 0x2ab   : > { %v1373_v48 = vpack.c.bf16 %v939_v23, %v939_v23  ;;  %v929_v4 = vperm.slane %v923_v15, %v2806_v58  ;;  %v995_v55 = vsel %vm526_vm11, %v3017_v60, %v994_v26  ;;  %v883_v49 = vsel %vm526_vm11, %v875_v50, %v882_v16 }
 0x2ac   : > { %v881_v31 = vsel %vm526_vm11, %v880_v45, %v863_v38  ;;  %v1377_v42 = vpack.c.bf16 %v995_v55, %v995_v55  ;;  %v936_v61 = vrot.slane %v917_v57, 4  ;;  %v1369_v0 = vpack.c.bf16 %v883_v49, %v883_v49 }
 0x2ad   : > { %v1443_v56 = vunpack.c.l.b16 %v1373_v48  ;;  %v934_v7 = vrot.slane %v929_v4, 4  ;;  %v1366_v34 = vpack.c.bf16 %v881_v31, %v881_v31  ;;  %v615_v35 = vperm.slane %v607_v47, %v2806_v58 }
 0x2ae   : > { %v1474_v36 = vunpack.c.l.b16 %v1377_v42  ;;  %v937_v27 = vsel %vm526_vm11, %v929_v4, %v936_v61  ;;  %v618_v51 = vrot.slane %v2992_v41, 4  ;;  %v1412_v44 = vunpack.c.l.b16 %v1369_v0 }
 0x2af   : > { %v1445_v22 = vpack.c.b16 %v1443_v56, %v1442_v43  ;;  %v935_v60 = vsel %vm526_vm11, %v934_v7, %v917_v57  ;;  %v1370_v46 = vpack.c.bf16 %v937_v27, %v937_v27  ;;  %v1381_v2 = vunpack.c.l.b16 %v1366_v34 }
 0x2b0   : > { %v1367_v62 = vpack.c.bf16 %v935_v60, %v935_v60  ;;  %v619_v3 = vsel %vm526_vm11, %v603_v29, %v618_v51  ;;  %v604_v6 = vrot.slane %v2989_v39, 4  ;;  %v616_v8 = vrot.slane %v603_v29, 4 }
 0x2b1   : > { %v1451_v1 = vsel %vm1386_vm12, %v1445_v22, 0  ;;  %v1413_v9 = vunpack.c.l.b16 %v1370_v46  ;;  %v627_v17 = vperm.slane %v619_v3, %v2806_v58  ;;  %v1476_v14 = vpack.c.b16 %v1474_v36, %v1474_v36 }
 0x2b2   : > { %1463 = vmatpush.bf16.xpose.msrb.mxu0 %v1451_v1  ;;  %v1382_v11 = vunpack.c.l.b16 %v1367_v62  ;;  %v605_v18 = vsel %vm526_vm11, %v604_v6, %v2977_v30  ;;  %v886_v19 = vrot.slane %v3046_v33, 4  ;;  %v617_v39 = vsel %vm526_vm11, %v616_v8, %v2992_v41 }
 0x2b3   : > { %v1415_v59 = vpack.c.b16 %v1413_v9, %v1412_v44  ;;  %v632_v43 = vrot.slane %v627_v17, 4  ;;  %v611_v38 = vperm.slane %v605_v18, %v2806_v58  ;;  %v623_v24 = vperm.slane %v617_v39, %v2806_v58 }
 0x2b4   : > { %v1384_v53 = vpack.c.b16 %v1382_v11, %v1381_v2  ;;  %v887_v13 = vsel %vm526_vm11, %v3042_v5, %v886_v19  ;;  %v940_v50 = vrot.slane %v3056_v40, 4  ;;  %v1484_v29 = vsel %vm1386_vm12, %v1476_v14, 0 }
 0x2b5   : > { %v1421_v25 = vsel %vm1386_vm12, %v1415_v59, 0  ;;  %v633_v30 = vsel %vm526_vm11, %v632_v43, %v615_v35  ;;  %v630_v33 = vrot.slane %v611_v38, 4  ;;  %v1375_v26 = vpack.c.bf16 %v887_v13, %v887_v13 }
 0x2b6   : > { %v1391_v28 = vsel %vm1386_vm12, %v1384_v53, 0  ;;  %1433 = vmatpush.bf16.xpose.msra.mxu3 %v1421_v25  ;;  %v628_v16 = vrot.slane %v623_v24, 4  ;;  %v941_v41 = vsel %vm526_vm11, %v3064_v63, %v940_v50  ;;  %v1364_v47 = vpack.c.bf16 %v633_v30, %v633_v30 }
 0x2b7   : > { %1403 = vmatpush.bf16.xpose.msra.mxu2 %v1391_v28  ;;  %v1376_v5 = vpack.c.bf16 %v941_v41, %v941_v41  ;;  %v1472_v23 = vunpack.c.l.b16 %v1375_v26  ;;  %v631_v40 = vsel %vm526_vm11, %v623_v24, %v630_v33  ;;  %v634_v55 = vrot.slane %v615_v35, 4 }
 0x2b8   : > { %v629_v45 = vsel %vm526_vm11, %v628_v16, %v611_v38  ;;  %v1363_v15 = vpack.c.bf16 %v631_v40, %v631_v40 }
 0x2b9   : > { %2073 = vmatmul.msk.bf16.vlgmr.msrb.gmra.mxu0 %vm1386_vm12, %v1364_v47  ;;  %v1473_v57 = vunpack.c.l.b16 %v1376_v5  ;;  %v1362_v4 = vpack.c.bf16 %v629_v45, %v629_v45  ;;  %v635_v49 = vsel %vm526_vm11, %v627_v17, %v634_v55 }
 0x2ba   : > { %v1365_v31 = vpack.c.bf16 %v635_v49, %v635_v49 }
 0x2bb   : > { %v1475_v48 = vpack.c.b16 %v1473_v57, %v1472_v23 }
 0x2bd   : > { %2072 = vmatmul.msk.bf16.vlgmr.msra.gmra.mxu3 %vm1386_vm12, %v1363_v15  ;;  %v1481_v63 = vsel %vm1386_vm12, %v1475_v48, 0 }
 0x2be   : > { %2071 = vmatmul.msk.bf16.vlgmr.msra.gmra.mxu2 %vm1386_vm12, %v1362_v4 }
 0x2bf   : > { %1492 = vmatpush.bf16.xpose.msrb.mxu2 %v1484_v29 }
 0x2c7   : > { %1493 = vmatpush.bf16.xpose.msrb.mxu2 %v1481_v63 }
 0x2ce   : > { %2074 = vmatmul.msk.bf16.vlgmr.msrb.gmra.mxu2 %vm1386_vm12, %v1365_v31 }
 0x2d2   : > { %v2211_v42 = vpop.permute.xlu2 %2210 }
 0x2d3   : > { %v2213_v61 = vunpack.i.h.bf16 %v2211_v42  ;;  %v2212_v0 = vunpack.i.l.bf16 %v2211_v42 }
 0x2d5   : > { %v1158_v7 = vrot.slane %v2213_v61, 4  ;;  %v1146_v34 = vrot.slane %v2212_v0, 4 }
 0x2ea   : > { %v2216_v56 = vpop.permute.xlu1 %2215 }
 0x2eb   : > { %v2218_v36 = vunpack.i.h.bf16 %v2216_v56  ;;  %v2217_v27 = vunpack.i.l.bf16 %v2216_v56 }
 0x2ed   : > { %v1156_v51 = vrot.slane %v2218_v36, 4  ;;  %v1144_v22 = vrot.slane %v2217_v27, 4  ;;  %v1147_v60 = vsel %vm526_vm11, %v2217_v27, %v1146_v34  ;;  %v1159_v46 = vsel %vm526_vm11, %v2218_v36, %v1158_v7 }
 0x2ee   : > { %v1155_v35 = vperm.slane %v1147_v60, %v2788_v37  ;;  %v1167_v44 = vperm.slane %v1159_v46, %v2788_v37 }
 0x2ef   : > { %v1145_v62 = vsel %vm526_vm11, %v1144_v22, %v2212_v0  ;;  %v1157_v2 = vsel %vm526_vm11, %v1156_v51, %v2213_v61 }
 0x2f0   : > { %v1151_v3 = vperm.slane %v1145_v62, %v2788_v37  ;;  %v1163_v6 = vperm.slane %v1157_v2, %v2788_v37  ;;  %v1180_v1 = vrot.slane %v1167_v44, 4  ;;  %v1182_v9 = vrot.slane %v1155_v35, 4 }
 0x2f2   : > { %v1168_v17 = vrot.slane %v1163_v6, 4  ;;  %v1170_v8 = vrot.slane %v1151_v3, 4  ;;  %v1181_v11 = vsel %vm526_vm11, %v1180_v1, %v1155_v35  ;;  %v1183_v14 = vsel %vm526_vm11, %v1167_v44, %v1182_v9 }
 0x2f3   : > { %v1187_v18 = vperm.slane %v1181_v11, %v2806_v58  ;;  %v1191_v19 = vperm.slane %v1183_v14, %v2806_v58 }
 0x2f4   : > { %v1169_v59 = vsel %vm526_vm11, %v1168_v17, %v1151_v3  ;;  %v1171_v43 = vsel %vm526_vm11, %v1163_v6, %v1170_v8 }
 0x2f5   : > { %v1175_v38 = vperm.slane %v1169_v59, %v2806_v58  ;;  %v1179_v39 = vperm.slane %v1171_v43, %v2806_v58  ;;  %v1196_v53 = vrot.slane %v1187_v18, 4  ;;  %v1198_v24 = vrot.slane %v1191_v19, 4 }
 0x2f7   : > { %v1192_v13 = vrot.slane %v1175_v38, 4  ;;  %v1194_v50 = vrot.slane %v1179_v39, 4  ;;  %v1199_v25 = vsel %vm526_vm11, 0.0, %v1198_v24  ;;  %v1319_v30 = vsel %vm526_vm11, %v1198_v24, %v1187_v18 }
 0x2f8   : > { %v1324_v33 = vrot.slane %v1199_v25, 4  ;;  %v1197_v28 = vsel %vm526_vm11, 0.0, %v1196_v53  ;;  %v1323_v41 = vperm.slane %v1319_v30, %v2788_v37 }
 0x2f9   : > { %v1195_v26 = vsel %vm526_vm11, 0.0, %v1194_v50  ;;  %v1308_v16 = vsel %vm526_vm11, %v1194_v50, %v1175_v38  ;;  %v1193_v23 = vsel %vm526_vm11, 0.0, %v1192_v13 }
 0x2fa   : > { %v1313_v29 = vrot.slane %v1195_v26, 4  ;;  %v1312_v47 = vperm.slane %v1308_v16, %v2788_v37  ;;  %v1325_v5 = vsel %vm526_vm11, %v1324_v33, %v1197_v28  ;;  %v1344_v45 = vrot.slane %v1323_v41, 4 }
 0x2fb   : > { %v1329_v40 = vperm.slane %v1325_v5, %v2788_v37 }
 0x2fc   : > { %v1314_v57 = vsel %vm526_vm11, %v1313_v29, %v1193_v23  ;;  %v1332_v15 = vrot.slane %v1312_v47, 4  ;;  %v2224_v29 = vpack.i.bf16 %v2785_v32, %v2802_v52  ;;  %v3178_v23 = vpop.permute.xlu0 %2205 }
 0x2fd   : > { %v1318_v48 = vperm.slane %v1314_v57, %v2788_v37  ;;  %v1345_v4 = vsel %vm526_vm11, %v1329_v40, %v1344_v45  ;;  %v1342_v63 = vrot.slane %v1329_v40, 4 }
 0x2fe   : > { %v1353_v55 = vperm.slane %v1345_v4, %v2806_v58 }
 0x2ff   : > { %v1333_v49 = vsel %vm526_vm11, %v1318_v48, %v1332_v15  ;;  %v1330_v31 = vrot.slane %v1318_v48, 4  ;;  %v1343_v42 = vsel %vm526_vm11, %v1342_v63, %v1323_v41 }
 0x300   : > { %v1341_v61 = vperm.slane %v1333_v49, %v2806_v58  ;;  %v1358_v0 = vrot.slane %v1353_v55, 4  ;;  %v1349_v56 = vperm.slane %v1343_v42, %v2806_v58 }
 0x301   : > { %v1331_v7 = vsel %vm526_vm11, %v1330_v31, %v1312_v47 }
 0x302   : > { %v1359_v34 = vsel %vm526_vm11, %v1358_v0, %v1341_v61  ;;  %v1360_v36 = vrot.slane %v1341_v61, 4  ;;  %v1337_v27 = vperm.slane %v1331_v7, %v2806_v58  ;;  %v1354_v51 = vrot.slane %v1349_v56, 4 }
 0x303   : > { %v1608_v22 = vpack.c.bf16 %v1359_v34, %v1359_v34  ;;  %v2207_v7 = vunpack.i.l.bf16 %v3178_v23 }
 0x304   : > { %v1355_v60 = vsel %vm526_vm11, %v1354_v51, %v1337_v27  ;;  %v1356_v46 = vrot.slane %v1337_v27, 4  ;;  %v1361_v35 = vsel %vm526_vm11, %v1353_v55, %v1360_v36 }
 0x305   : > { %v1674_v44 = vunpack.c.l.b16 %v1608_v22  ;;  %v1602_v62 = vpack.c.bf16 %v1355_v60, %v1355_v60  ;;  %v1611_v2 = vpack.c.bf16 %v1361_v35, %v1361_v35 }
 0x306   : > { %v1357_v3 = vsel %vm526_vm11, %v1349_v56, %v1356_v46  ;;  %v2208_v56 = vunpack.i.h.bf16 %v3178_v23 }
 0x307   : > { %v1676_v6 = vpack.c.b16 %v1674_v44, %v1674_v44  ;;  %v1617_v1 = vunpack.c.l.b16 %v1602_v62  ;;  %v1702_v9 = vunpack.c.l.b16 %v1611_v2  ;;  %v1605_v17 = vpack.c.bf16 %v1357_v3, %v1357_v3 }
 0x308   : > { %v1090_v60 = vrot.slane %v2208_v56, 4 }
 0x309   : > { %v1682_v8 = vsel %vm1624_vm13, %v1676_v6, 0  ;;  %v1619_v11 = vpack.c.b16 %v1617_v1, %v1617_v1  ;;  %v1704_v14 = vpack.c.b16 %v1702_v9, %v1702_v9  ;;  %v1646_v18 = vunpack.c.l.b16 %v1605_v17 }
 0x30a   : > { %1690 = vmatpush.bf16.msrb.mxu1 %v1682_v8  ;;  %v1034_v6 = vrot.slane %v2207_v7, 4 }
 0x30b   : > { %v1626_v19 = vsel %vm1624_vm13, %v1619_v11, 0  ;;  %v1710_v59 = vsel %vm1624_vm13, %v1704_v14, 0  ;;  %v1648_v43 = vpack.c.b16 %v1646_v18, %v1646_v18 }
 0x30c   : > { %1634 = vmatpush.bf16.msrb.mxu3 %v1626_v19  ;;  %1718 = vmatpush.bf16.msra.mxu2 %v1710_v59 }
 0x30d   : > { %v1654_v38 = vsel %vm1624_vm13, %v1648_v43, 0 }
 0x30e   : > { %1662 = vmatpush.bf16.msra.mxu0 %v1654_v38 }
 0x336   : > { %v1465_v39 = vpop.f32.mrf.mxu0 }
 0x337   : > { %v1506_v53 = vsel %vm1499_vm14, %v1465_v39, -inf }
 0x338   : > { %1507 = vmax.xlane.f32.xlu1 %v1506_v53 }
 0x33e   : > { %v1467_v24 = vpop.f32.mrf.mxu0 }
 0x340   : > { %v1435_v13 = vpop.f32.mrf.mxu3 }
 0x341   : > { %v1405_v50 = vpop.f32.mrf.mxu2  ;;  %v1503_v26 = vsel %vm1499_vm14, %v1435_v13, -inf }
 0x342   : > { %v1500_v25 = vsel %vm1499_vm14, %v1405_v50, -inf }
 0x343   : > { %1501 = vmax.xlane.f32.xlu0 %v1500_v25 }
 0x348   : > { %v1437_v30 = vpop.f32.mrf.mxu3 }
 0x349   : > { %v1407_v33 = vpop.f32.mrf.mxu2 }
 0x34b   : > { %1504 = vmax.xlane.f32.xlu0 %v1503_v26 }
 0x351   : > { %v1495_v28 = vpop.f32.mrf.mxu2  ;;  %2230 = vrot.lane.b32.xlu1 %v2836_v20, %s2535_s2 }
 0x352   : > { %v1509_v16 = vsel %vm1499_vm14, %v1495_v28, -inf }
 0x353   : > { %1510 = vmax.xlane.f32.xlu2 %v1509_v16 }
 0x359   : > { %v1497_v41 = vpop.f32.mrf.mxu2 }
 0x35f   : > { %2225 = vrot.lane.b32.xlu0 %v2224_v29, %s2535_s2 }
 0x36b   : > { %2220 = vrot.lane.b32.xlu2 %v2219_v54, %s2535_s2 }
 0x3ab   : > { %v1508_v47 = vpop.xlane.xlu1 %1507 }
 0x3ac   : > { %v1514_v5 = vsub.f32 %v1465_v39, %v1508_v47 }
 0x3ae   : > { %v1520_v40 = vmul.f32 1.442695, %v1514_v5 }
 0x3b0   : > { %2242 = vpow2.f32 %v1520_v40 }
 0x3b6   : > { %v3180_v20 = vpop.eup %2242  ;;  %v1502_v45 = vpop.xlane.xlu0 %1501 }
 0x3b7   : > { %v1512_v57 = vsub.f32 %v1405_v50, %v1502_v45  ;;  %v1530_v32 = vsel %vm1499_vm14, %v3180_v20, 0.0 }
 0x3b8   : > { %1531 = vadd.xlane.f32.xlu1 %v1530_v32 }
 0x3b9   : > { %v1516_v52 = vmul.f32 1.442695, %v1512_v57 }
 0x3bb   : > { %2244 = vpow2.f32 %v1516_v52 }
 0x3be   : > { %v1505_v15 = vpop.xlane.xlu0 %1504 }
 0x3bf   : > { %v1513_v48 = vsub.f32 %v1435_v13, %v1505_v15 }
 0x3c1   : > { %v3184_v10 = vpop.eup %2244  ;;  %v1518_v21 = vmul.f32 1.442695, %v1513_v48 }
 0x3c2   : > { %v1524_v54 = vsel %vm1499_vm14, %v3184_v10, 0.0 }
 0x3c3   : > { %2246 = vpow2.f32 %v1518_v21  ;;  %1525 = vadd.xlane.f32.xlu2 %v1524_v54  ;;  %v2231_v55 = vpop.permute.xlu1 %2230 }
 0x3c4   : > { %v2233_v61 = vunpack.i.h.bf16 %v2231_v55  ;;  %v2232_v0 = vunpack.i.l.bf16 %v2231_v55 }
 0x3c6   : > { %v1511_v4 = vpop.xlane.xlu2 %1510  ;;  %v1100_v36 = vrot.slane %v2233_v61, 4  ;;  %v1044_v27 = vrot.slane %v2232_v0, 4 }
 0x3c7   : > { %v1515_v63 = vsub.f32 %v1495_v28, %v1511_v4 }
 0x3c9   : > { %v3188_v49 = vpop.eup %2246  ;;  %v1522_v31 = vmul.f32 1.442695, %v1515_v63 }
 0x3ca   : > { %v1527_v42 = vsel %vm1499_vm14, %v3188_v49, 0.0 }
 0x3cb   : > { %2248 = vpow2.f32 %v1522_v31  ;;  %1528 = vadd.xlane.f32.xlu2 %v1527_v42 }
 0x3ce   : > { %v2221_v34 = vpop.permute.xlu2 %2220 }
 0x3cf   : > { %v2223_v51 = vunpack.i.h.bf16 %v2221_v34  ;;  %v2222_v22 = vunpack.i.l.bf16 %v2221_v34 }
 0x3d1   : > { %v3194_v46 = vpop.eup %2248  ;;  %v1101_v35 = vsel %vm526_vm11, %v1100_v36, %v2223_v51  ;;  %v1102_v44 = vrot.slane %v2223_v51, 4  ;;  %v1045_v62 = vsel %vm526_vm11, %v1044_v27, %v2222_v22  ;;  %v1046_v2 = vrot.slane %v2222_v22, 4  ;;  %v2226_v3 = vpop.permute.xlu0 %2225 }
 0x3d2   : > { %v1107_v1 = vperm.slane %v1101_v35, %v2788_v37  ;;  %v2228_v9 = vunpack.i.h.bf16 %v2226_v3  ;;  %v2227_v17 = vunpack.i.l.bf16 %v2226_v3  ;;  %v1051_v14 = vperm.slane %v1045_v62, %v2788_v37 }
 0x3d3   : > { %v1103_v8 = vsel %vm526_vm11, %v2233_v61, %v1102_v44  ;;  %v1047_v11 = vsel %vm526_vm11, %v2232_v0, %v1046_v2  ;;  %v1533_v18 = vsel %vm1499_vm14, %v3194_v46, 0.0 }
 0x3d4   : > { %v1111_v19 = vperm.slane %v1103_v8, %v2788_v37  ;;  %v1055_v59 = vperm.slane %v1047_v11, %v2788_v37  ;;  %1534 = vadd.xlane.f32.xlu0 %v1533_v18  ;;  %v1088_v43 = vrot.slane %v2228_v9, 4  ;;  %v1091_v38 = vsel %vm526_vm11, %v2228_v9, %v1090_v60 }
 0x3d5   : > { %v1032_v39 = vrot.slane %v2227_v17, 4  ;;  %v1035_v53 = vsel %vm526_vm11, %v2227_v17, %v1034_v6  ;;  %v1099_v50 = vperm.slane %v1091_v38, %v2788_v37  ;;  %v1112_v30 = vrot.slane %v1107_v1, 4 }
 0x3d6   : > { %v1124_v24 = vrot.slane %v1111_v19, 4  ;;  %v1068_v13 = vrot.slane %v1055_v59, 4  ;;  %v1043_v25 = vperm.slane %v1035_v53, %v2788_v37  ;;  %v1056_v33 = vrot.slane %v1051_v14, 4 }
 0x3d7   : > { %v1089_v26 = vsel %vm526_vm11, %v1088_v43, %v2208_v56  ;;  %v1033_v28 = vsel %vm526_vm11, %v1032_v39, %v2207_v7  ;;  %v1126_v41 = vrot.slane %v1099_v50, 4 }
 0x3d8   : > { %v1095_v16 = vperm.slane %v1089_v26, %v2788_v37  ;;  %v1039_v29 = vperm.slane %v1033_v28, %v2788_v37  ;;  %v1069_v47 = vsel %vm526_vm11, %v1068_v13, %v1043_v25  ;;  %v1070_v5 = vrot.slane %v1043_v25, 4 }
 0x3d9   : > { %v1075_v23 = vperm.slane %v1069_v47, %v2806_v58  ;;  %v1125_v40 = vsel %vm526_vm11, %v1124_v24, %v1099_v50  ;;  %v1127_v31 = vsel %vm526_vm11, %v1111_v19, %v1126_v41 }
 0x3da   : > { %v1114_v45 = vrot.slane %v1095_v16, 4  ;;  %v1057_v57 = vsel %vm526_vm11, %v1056_v33, %v1039_v29  ;;  %v1058_v32 = vrot.slane %v1039_v29, 4  ;;  %v1113_v52 = vsel %vm526_vm11, %v1112_v30, %v1095_v16 }
 0x3db   : > { %v1063_v15 = vperm.slane %v1057_v57, %v2806_v58  ;;  %v1071_v48 = vsel %vm526_vm11, %v1055_v59, %v1070_v5  ;;  %v1084_v21 = vrot.slane %v1075_v23, 4  ;;  %v1119_v54 = vperm.slane %v1113_v52, %v2806_v58 }
 0x3dc   : > { %v1059_v4 = vsel %vm526_vm11, %v1051_v14, %v1058_v32  ;;  %v1079_v63 = vperm.slane %v1071_v48, %v2806_v58  ;;  %v1115_v55 = vsel %vm526_vm11, %v1107_v1, %v1114_v45  ;;  %v1131_v7 = vperm.slane %v1125_v40, %v2806_v58 }
 0x3dd   : > { %v1067_v42 = vperm.slane %v1059_v4, %v2806_v58  ;;  %v1080_v61 = vrot.slane %v1063_v15, 4  ;;  %v1123_v0 = vperm.slane %v1115_v55, %v2806_v58  ;;  %v1135_v34 = vperm.slane %v1127_v31, %v2806_v58 }
 0x3de   : > { %v1086_v56 = vrot.slane %v1079_v63, 4  ;;  %v1136_v36 = vrot.slane %v1119_v54, 4  ;;  %v1085_v51 = vsel %vm526_vm11, 0.0, %v1084_v21  ;;  %v1140_v44 = vrot.slane %v1131_v7, 4 }
 0x3df   : > { %v1082_v27 = vrot.slane %v1067_v42, 4  ;;  %v1138_v22 = vrot.slane %v1123_v0, 4  ;;  %v1081_v60 = vsel %vm526_vm11, 0.0, %v1080_v61  ;;  %v1142_v62 = vrot.slane %v1135_v34, 4 }
 0x3e0   : > { %v1087_v35 = vsel %vm526_vm11, 0.0, %v1086_v56  ;;  %v1211_v2 = vsel %vm526_vm11, %v1086_v56, %v1075_v23  ;;  %v1137_v9 = vsel %vm526_vm11, 0.0, %v1136_v36  ;;  %v1141_v17 = vsel %vm526_vm11, 0.0, %v1140_v44 }
 0x3e1   : > { %v1083_v3 = vsel %vm526_vm11, 0.0, %v1082_v27  ;;  %v1139_v6 = vsel %vm526_vm11, 0.0, %v1138_v22  ;;  %v1216_v1 = vrot.slane %v1087_v35, 4  ;;  %v1143_v8 = vsel %vm526_vm11, 0.0, %v1142_v62 }
 0x3e2   : > { %v1205_v11 = vrot.slane %v1083_v3, 4  ;;  %v1259_v14 = vrot.slane %v1139_v6, 4  ;;  %v1265_v18 = vsel %vm526_vm11, %v1142_v62, %v1131_v7  ;;  %v1270_v19 = vrot.slane %v1143_v8, 4 }
 0x3e3   : > { %v1200_v59 = vsel %vm526_vm11, %v1082_v27, %v1063_v15  ;;  %v1215_v43 = vperm.slane %v1211_v2, %v2788_v37  ;;  %v1217_v53 = vsel %vm526_vm11, %v1216_v1, %v1085_v51  ;;  %v1254_v24 = vsel %vm526_vm11, %v1138_v22, %v1119_v54 }
 0x3e4   : > { %v1204_v38 = vperm.slane %v1200_v59, %v2788_v37  ;;  %v1206_v39 = vsel %vm526_vm11, %v1205_v11, %v1081_v60  ;;  %v1221_v50 = vperm.slane %v1217_v53, %v2788_v37  ;;  %v1258_v30 = vperm.slane %v1254_v24, %v2788_v37 }
 0x3e5   : > { %v1210_v13 = vperm.slane %v1206_v39, %v2788_v37  ;;  %v1236_v25 = vrot.slane %v1215_v43, 4  ;;  %v1260_v26 = vsel %vm526_vm11, %v1259_v14, %v1137_v9  ;;  %v1269_v28 = vperm.slane %v1265_v18, %v2788_v37 }
 0x3e6   : > { %v1224_v33 = vrot.slane %v1204_v38, 4  ;;  %v1271_v16 = vsel %vm526_vm11, %v1270_v19, %v1141_v17  ;;  %v1264_v29 = vperm.slane %v1260_v26, %v2788_v37  ;;  %v1278_v5 = vrot.slane %v1258_v30, 4 }
 0x3e7   : > { %v1237_v41 = vsel %vm526_vm11, %v1221_v50, %v1236_v25  ;;  %v1275_v47 = vperm.slane %v1271_v16, %v2788_v37  ;;  %v1290_v45 = vrot.slane %v1269_v28, 4  ;;  %v1222_v57 = vrot.slane %v1210_v13, 4 }
 0x3e8   : > { %v1225_v23 = vsel %vm526_vm11, %v1210_v13, %v1224_v33  ;;  %v1245_v40 = vperm.slane %v1237_v41, %v2806_v58  ;;  %v1279_v52 = vsel %vm526_vm11, %v1264_v29, %v1278_v5  ;;  %v1234_v15 = vrot.slane %v1221_v50, 4 }
 0x3e9   : > { %v1233_v32 = vperm.slane %v1225_v23, %v2806_v58  ;;  %v1276_v48 = vrot.slane %v1264_v29, 4  ;;  %v1287_v54 = vperm.slane %v1279_v52, %v2806_v58  ;;  %v1291_v4 = vsel %vm526_vm11, %v1275_v47, %v1290_v45 }
 0x3ea   : > { %v1250_v21 = vrot.slane %v1245_v40, 4  ;;  %v1223_v63 = vsel %vm526_vm11, %v1222_v57, %v1204_v38  ;;  %v1299_v31 = vperm.slane %v1291_v4, %v2806_v58  ;;  %v1235_v61 = vsel %vm526_vm11, %v1234_v15, %v1215_v43 }
 0x3eb   : > { %v1252_v55 = vrot.slane %v1233_v32, 4  ;;  %v1229_v42 = vperm.slane %v1223_v63, %v2806_v58  ;;  %v1306_v56 = vrot.slane %v1287_v54, 4  ;;  %v1241_v7 = vperm.slane %v1235_v61, %v2806_v58 }
 0x3ec   : > { %v1251_v0 = vsel %vm526_vm11, %v1250_v21, %v1233_v32  ;;  %v1277_v34 = vsel %vm526_vm11, %v1276_v48, %v1258_v30  ;;  %v1304_v36 = vrot.slane %v1299_v31, 4  ;;  %v1288_v35 = vrot.slane %v1275_v47, 4 }
 0x3ed   : > { %v1606_v27 = vpack.c.bf16 %v1251_v0, %v1251_v0  ;;  %v1248_v51 = vrot.slane %v1229_v42, 4  ;;  %v1283_v22 = vperm.slane %v1277_v34, %v2806_v58  ;;  %v1246_v60 = vrot.slane %v1241_v7, 4 }
 0x3ee   : > { %v1253_v44 = vsel %vm526_vm11, %v1245_v40, %v1252_v55  ;;  %v1307_v62 = vsel %vm526_vm11, %v1299_v31, %v1306_v56  ;;  %v1305_v2 = vsel %vm526_vm11, %v1304_v36, %v1287_v54  ;;  %v1289_v8 = vsel %vm526_vm11, %v1288_v35, %v1269_v28 }
 0x3ef   : > { %v1672_v3 = vunpack.c.l.b16 %v1606_v27  ;;  %v1302_v6 = vrot.slane %v1283_v22, 4  ;;  %v1609_v1 = vpack.c.bf16 %v1253_v44, %v1253_v44  ;;  %v1607_v9 = vpack.c.bf16 %v1305_v2, %v1305_v2 }
 0x3f0   : > { %v1247_v17 = vsel %vm526_vm11, %v1246_v60, %v1229_v42  ;;  %v1610_v11 = vpack.c.bf16 %v1307_v62, %v1307_v62  ;;  %v1295_v14 = vperm.slane %v1289_v8, %v2806_v58  ;;  %v1249_v19 = vsel %vm526_vm11, %v1241_v7, %v1248_v51 }
 0x3f1   : > { %v1700_v18 = vunpack.c.l.b16 %v1609_v1  ;;  %v1673_v59 = vunpack.c.l.b16 %v1607_v9  ;;  %v1600_v43 = vpack.c.bf16 %v1247_v17, %v1247_v17  ;;  %v1603_v39 = vpack.c.bf16 %v1249_v19, %v1249_v19 }
 0x3f2   : > { %v1701_v38 = vunpack.c.l.b16 %v1610_v11  ;;  %v1300_v53 = vrot.slane %v1295_v14, 4  ;;  %v1303_v24 = vsel %vm526_vm11, %v1295_v14, %v1302_v6 }
 0x3f3   : > { %v1675_v13 = vpack.c.b16 %v1673_v59, %v1672_v3  ;;  %v1604_v25 = vpack.c.bf16 %v1303_v24, %v1303_v24  ;;  %v1644_v30 = vunpack.c.l.b16 %v1603_v39  ;;  %v1615_v28 = vunpack.c.l.b16 %v1600_v43 }
 0x3f4   : > { %v1703_v50 = vpack.c.b16 %v1701_v38, %v1700_v18  ;;  %v1301_v33 = vsel %vm526_vm11, %v1300_v53, %v1283_v22 }
 0x3f5   : > { %1691 = vmatpush.bf16.msrb.mxu1 %v1675_v13  ;;  %v1601_v26 = vpack.c.bf16 %v1301_v33, %v1301_v33  ;;  %v1645_v16 = vunpack.c.l.b16 %v1604_v25 }
 0x3f6   : > { %1719 = vmatpush.bf16.msra.mxu2 %v1703_v50 }
 0x3f7   : > { %v1616_v41 = vunpack.c.l.b16 %v1601_v26  ;;  %v1647_v29 = vpack.c.b16 %v1645_v16, %v1644_v30 }
 0x3f9   : > { %v1618_v47 = vpack.c.b16 %v1616_v41, %v1615_v28  ;;  %1663 = vmatpush.bf16.msra.mxu0 %v1647_v29 }
 0x3fb   : > { %1635 = vmatpush.bf16.msrb.mxu3 %v1618_v47 }
 0x42b   : > { %v1532_v5 = vpop.xlane.xlu1 %1531 }
 0x42c   : > { %2250 = vrcp.f32 %v1532_v5  ;;  %v1577_v57 = vand.u32 2147483648, %v1532_v5  ;;  %v1575_v15 = vand.u32 2147483647, %v1532_v5  ;;  %vm1571_vm1 = vweird.f32 %v1532_v5 }
 0x42e   : > { %v1578_v21 = vor.u32 1.1754944e-38, %v1577_v57  ;;  %vm1576_vm3 = vcmp.eq.f32.partialorder %v1575_v15, 8.507059e+37 }
 0x432   : > { %v2251_v23 = vpop.eup %2250 }
 0x433   : > { %v1567_v40 = vmul.f32 %v2251_v23, %v1532_v5  ;;  %vm1572_vm15 = vweird.f32 %v2251_v23 }
 0x434   : > { %vm1573_vm2 = vmor %vm1571_vm1, %vm1572_vm15 }
 0x435   : > { %v1568_v45 = vsub.f32 1.0, %v1567_v40 }
 0x436   : > { %v1526_v32 = vpop.xlane.xlu2 %1525 }
 0x437   : > { %v1569_v52 = vmul.f32 %v2251_v23, %v1568_v45  ;;  %2252 = vrcp.f32 %v1526_v32  ;;  %v1547_v56 = vand.u32 2147483648, %v1526_v32  ;;  %v1545_v34 = vand.u32 2147483647, %v1526_v32 }
 0x438   : > { %vm1541_vm5 = vweird.f32 %v1526_v32 }
 0x439   : > { %v1570_v48 = vadd.f32 %v2251_v23, %v1569_v52  ;;  %v1548_v51 = vor.u32 1.1754944e-38, %v1547_v56  ;;  %vm1546_vm7 = vcmp.eq.f32.partialorder %v1545_v34, 8.507059e+37 }
 0x43b   : > { %v1574_v54 = vsel %vm1573_vm2, %v2251_v23, %v1570_v48 }
 0x43c   : > { %v1579_v4 = vsel %vm1576_vm3, %v1578_v21, %v1574_v54 }
 0x43d   : > { %v2253_v63 = vpop.eup %2252  ;;  %v1580_v55 = vmul.f32 %v3180_v20, %v1579_v4 }
 0x43e   : > { %v1537_v31 = vmul.f32 %v2253_v63, %v1526_v32  ;;  %v1529_v42 = vpop.xlane.xlu2 %1528  ;;  %vm1542_vm4 = vweird.f32 %v2253_v63 }
 0x43f   : > { %2254 = vrcp.f32 %v1529_v42  ;;  %v1598_v0 = vpack.c.bf16 %v1580_v55, %v1580_v55  ;;  %vm1543_vm6 = vmor %vm1541_vm5, %vm1542_vm4  ;;  %v1562_v62 = vand.u32 2147483648, %v1529_v42  ;;  %v1560_v6 = vand.u32 2147483647, %v1529_v42 }
 0x440   : > { %v1538_v61 = vsub.f32 1.0, %v1537_v31  ;;  %vm1556_vm9 = vweird.f32 %v1529_v42  ;;  %vm1848_vm4 = vcmask 130048  }
 0x441   : > { %2077 = vmatmul.msk.bf16.vlgmr.msrb.gmra.mxu1 %vm1499_vm14, %v1598_v0  ;;  %v1563_v17 = vor.u32 1.1754944e-38, %v1562_v62  ;;  %vm1561_vm13 = vcmp.eq.f32.partialorder %v1560_v6, 8.507059e+37 }
 0x442   : > { %v1539_v7 = vmul.f32 %v2253_v63, %v1538_v61 }
 0x444   : > { %v1540_v36 = vadd.f32 %v2253_v63, %v1539_v7 }
 0x445   : > { %v2255_v27 = vpop.eup %2254 }
 0x446   : > { %v1552_v22 = vmul.f32 %v2255_v27, %v1529_v42  ;;  %v1544_v60 = vsel %vm1543_vm6, %v2253_v63, %v1540_v36  ;;  %vm1557_vm8 = vweird.f32 %v2255_v27 }
 0x447   : > { %v1535_v20 = vpop.xlane.xlu0 %1534  ;;  %v1549_v35 = vsel %vm1546_vm7, %v1548_v51, %v1544_v60  ;;  %vm1558_vm10 = vmor %vm1556_vm9, %vm1557_vm8 }
 0x448   : > { %v1553_v44 = vsub.f32 1.0, %v1552_v22  ;;  %2256 = vrcp.f32 %v1535_v20  ;;  %v1550_v2 = vmul.f32 %v3184_v10, %v1549_v35  ;;  %v1592_v43 = vand.u32 2147483648, %v1535_v20 }
 0x449   : > { %v1590_v39 = vand.u32 2147483647, %v1535_v20  ;;  %vm1586_vm1 = vweird.f32 %v1535_v20 }
 0x44a   : > { %v1554_v3 = vmul.f32 %v2255_v27, %v1553_v44  ;;  %v1596_v1 = vpack.c.bf16 %v1550_v2, %v1550_v2  ;;  %v1593_v24 = vor.u32 1.1754944e-38, %v1592_v43 }
 0x44b   : > { %vm1591_vm3 = vcmp.eq.f32.partialorder %v1590_v39, 8.507059e+37 }
 0x44c   : > { %v1555_v9 = vadd.f32 %v2255_v27, %v1554_v3  ;;  %2075 = vmatmul.msk.bf16.vlgmr.msrb.gmra.mxu3 %vm1499_vm14, %v1596_v1 }
 0x44e   : > { %v2257_v8 = vpop.eup %2256  ;;  %v1559_v11 = vsel %vm1558_vm10, %v2255_v27, %v1555_v9 }
 0x44f   : > { %v1564_v14 = vsel %vm1561_vm13, %v1563_v17, %v1559_v11  ;;  %v1582_v18 = vmul.f32 %v2257_v8, %v1535_v20  ;;  %vm1587_vm15 = vweird.f32 %v2257_v8 }
 0x450   : > { %v1565_v19 = vmul.f32 %v3188_v49, %v1564_v14  ;;  %vm1588_vm2 = vmor %vm1586_vm1, %vm1587_vm15 }
 0x451   : > { %v1583_v59 = vsub.f32 1.0, %v1582_v18 }
 0x452   : > { %v1597_v10 = vpack.c.bf16 %v1565_v19, %v1565_v19 }
 0x453   : > { %v1584_v38 = vmul.f32 %v2257_v8, %v1583_v59 }
 0x454   : > { %2076 = vmatmul.msk.bf16.vlgmr.msra.gmra.mxu0 %vm1499_vm14, %v1597_v10 }
 0x455   : > { %v1585_v53 = vadd.f32 %v2257_v8, %v1584_v38 }
 0x457   : > { %v1589_v13 = vsel %vm1588_vm2, %v2257_v8, %v1585_v53 }
 0x458   : > { %v1594_v50 = vsel %vm1591_vm3, %v1593_v24, %v1589_v13 }
 0x459   : > { %v1595_v25 = vmul.f32 %v3194_v46, %v1594_v50 }
 0x45b   : > { %v1599_v30 = vpack.c.bf16 %v1595_v25, %v1595_v25 }
 0x45d   : > { %2078 = vmatmul.msk.bf16.vlgmr.msra.gmra.mxu2 %vm1499_vm14, %v1599_v30 }
 0x4be   : > { %v1693_v49 = vpop.f32.mrf.mxu1 }
 0x4bf   : > { %v1725_v47 = vrot.slane %v1693_v49, 4 }
 0x4c6   : > { %v1695_v33 = vpop.f32.mrf.mxu1 }
 0x4cf   : > { %v1637_v26 = vpop.f32.mrf.mxu3 }
 0x4d0   : > { %v1727_v16 = vrot.slane %v1637_v26, 4  ;;  %v1726_v23 = vsel %vm526_vm11, %v1725_v47, %v1637_v26 }
 0x4d1   : > { %v1665_v28 = vpop.f32.mrf.mxu0  ;;  %v1732_v46 = vperm.slane %v1726_v23, %v2788_v37  ;;  %v1855_v23 = vld [vmem:[#allocation11 + $0x18] sm:$0xff] }
 0x4d2   : > { %v1728_v5 = vsel %vm526_vm11, %v1693_v49, %v1727_v16  ;;  %v1739_v45 = vrot.slane %v1665_v28, 4 }
 0x4d3   : > { %v1736_v40 = vperm.slane %v1728_v5, %v2788_v37  ;;  %v1751_v54 = vrot.slane %v1732_v46, 4  ;;  %v1854_v5 = vld [vmem:[#allocation11 + $0x10] sm:$0xff] }
 0x4d5   : > { %v1763_v15 = vrot.slane %v1736_v40, 4 }
 0x4d7   : > { %v1639_v41 = vpop.f32.mrf.mxu3 }
 0x4d9   : > { %v1667_v29 = vpop.f32.mrf.mxu0 }
 0x4e0   : > { %v1721_v57 = vpop.f32.mrf.mxu2 }
 0x4e1   : > { %v1737_v32 = vrot.slane %v1721_v57, 4  ;;  %v1740_v52 = vsel %vm526_vm11, %v1721_v57, %v1739_v45  ;;  %v1852_v45 = vld [vmem:[#allocation11] sm:$0xff] }
 0x4e2   : > { %v1748_v48 = vperm.slane %v1740_v52, %v2788_v37 }
 0x4e3   : > { %v1738_v21 = vsel %vm526_vm11, %v1737_v32, %v1665_v28 }
 0x4e4   : > { %v1744_v4 = vperm.slane %v1738_v21, %v2788_v37  ;;  %v1761_v63 = vrot.slane %v1748_v48, 4  ;;  %v1764_v55 = vsel %vm526_vm11, %v1748_v48, %v1763_v15 }
 0x4e5   : > { %v1772_v31 = vperm.slane %v1764_v55, %v2806_v58 }
 0x4e6   : > { %v1749_v42 = vrot.slane %v1744_v4, 4  ;;  %v1752_v61 = vsel %vm526_vm11, %v1744_v4, %v1751_v54  ;;  %v1762_v0 = vsel %vm526_vm11, %v1761_v63, %v1736_v40  ;;  %v1857_v40 = vpack.c.bf16 %v1855_v23, %v1854_v5 }
 0x4e7   : > { %v1760_v56 = vperm.slane %v1752_v61, %v2806_v58  ;;  %v1768_v7 = vperm.slane %v1762_v0, %v2806_v58  ;;  %v1779_v34 = vrot.slane %v1772_v31, 4 }
 0x4e8   : > { %v1750_v36 = vsel %vm526_vm11, %v1749_v42, %v1732_v46  ;;  %v1723_v27 = vpop.f32.mrf.mxu2  ;;  %1867 = vmatpush.bf16.msra.mxu3 %v1857_v40  ;;  %v1853_v46 = vld [vmem:[#allocation11 + $0x8] sm:$0xff] }
 0x4e9   : > { %v1756_v51 = vperm.slane %v1750_v36, %v2806_v58  ;;  %v1775_v22 = vrot.slane %v1760_v56, 4  ;;  %v1777_v60 = vrot.slane %v1768_v7, 4  ;;  %v1780_v20 = vsel %vm526_vm11, 0.0, %v1779_v34 }
 0x4ea   : > { %v1792_v35 = vsel %vm526_vm11, %v1779_v34, %v1768_v7  ;;  %v1797_v44 = vrot.slane %v1780_v20, 4  ;;  %v1856_v57 = vpack.c.bf16 %v1853_v46, %v1852_v45 }
 0x4eb   : > { %v1773_v62 = vrot.slane %v1756_v51, 4  ;;  %v1776_v2 = vsel %vm526_vm11, 0.0, %v1775_v22  ;;  %v1778_v3 = vsel %vm526_vm11, 0.0, %v1777_v60  ;;  %v1796_v6 = vperm.slane %v1792_v35, %v2788_v37 }
 0x4ec   : > { %v1786_v1 = vrot.slane %v1776_v2, 4  ;;  %v1781_v9 = vsel %vm526_vm11, %v1775_v22, %v1756_v51  ;;  %v1798_v17 = vsel %vm526_vm11, %v1797_v44, %v1778_v3  ;;  %1868 = vmatpush.bf16.msra.mxu3 %v1856_v57  ;;  %v2260_v44 = vld [vmem:[#allocation7] sm:$0x3f] }
 0x4ed   : > { %v1774_v8 = vsel %vm526_vm11, 0.0, %v1773_v62  ;;  %v1785_v11 = vperm.slane %v1781_v9, %v2788_v37  ;;  %v1802_v14 = vperm.slane %v1798_v17, %v2788_v37  ;;  %v1817_v18 = vrot.slane %v1796_v6, 4 }
 0x4ee   : > { %v1787_v19 = vsel %vm526_vm11, %v1786_v1, %v1774_v8  ;;  %v1896_v62 = vperm.slane %v2260_v44, 4  ;;  %v1898_v3 = vperm.slane %v2260_v44, 5 }
 0x4ef   : > { %v1791_v59 = vperm.slane %v1787_v19, %v2788_v37  ;;  %v1805_v43 = vrot.slane %v1785_v11, 4  ;;  %v1818_v10 = vsel %vm526_vm11, %v1802_v14, %v1817_v18  ;;  %v1815_v38 = vrot.slane %v1802_v14, 4 }
 0x4f0   : > { %v1826_v39 = vperm.slane %v1818_v10, %v2806_v58 }
 0x4f1   : > { %v1806_v53 = vsel %vm526_vm11, %v1791_v59, %v1805_v43  ;;  %v1803_v24 = vrot.slane %v1791_v59, 4  ;;  %v1816_v25 = vsel %vm526_vm11, %v1815_v38, %v1796_v6 }
 0x4f2   : > { %v1814_v13 = vperm.slane %v1806_v53, %v2806_v58  ;;  %v1831_v50 = vrot.slane %v1826_v39, 4  ;;  %v1822_v26 = vperm.slane %v1816_v25, %v2806_v58 }
 0x4f3   : > { %v1804_v30 = vsel %vm526_vm11, %v1803_v24, %v1785_v11 }
 0x4f4   : > { %v1832_v49 = vsel %vm526_vm11, %v1831_v50, %v1814_v13  ;;  %v1833_v33 = vrot.slane %v1814_v13, 4  ;;  %v1810_v37 = vperm.slane %v1804_v30, %v2806_v58  ;;  %v1827_v29 = vrot.slane %v1822_v26, 4 }
 0x4f5   : > { %1840 = vrot.lane.b32.xlu1 %v1832_v49, %s2538_s3 }
 0x4f6   : > { %v1834_v28 = vsel %vm526_vm11, %v1826_v39, %v1833_v33  ;;  %v1829_v16 = vrot.slane %v1810_v37, 4  ;;  %v1828_v47 = vsel %vm526_vm11, %v1827_v29, %v1810_v37 }
 0x4f7   : > { %1844 = vrot.lane.b32.xlu2 %v1834_v28, %s2539_s30 }
 0x4f8   : > { %v1830_v41 = vsel %vm526_vm11, %v1822_v26, %v1829_v16 }
 0x4f9   : > { %1836 = vrot.lane.b32.xlu0 %v1830_v41, %s2540_s9 }
 0x551   : > { %v1845_v15 = vpop.permute.xlu2 %1844 }
 0x567   : > { %v1841_v32 = vpop.permute.xlu1 %1840 }
 0x56b   : > { %v1837_v58 = vpop.permute.xlu0 %1836 }
 0x56c   : > { %v1847_v52 = vsel %vm1386_vm12, %v1828_v47, %v1837_v58 }
 0x56d   : > { %v1849_v48 = vsel %vm1848_vm4, %v1847_v52, %v1841_v32 }
 0x56e   : > { %v1850_v21 = vsel %vm1499_vm14, %v1849_v48, %v1845_v15 }
 0x56f   : > { %v1851_v54 = vpack.c.bf16 %v1850_v21, %v1850_v21 }
 0x571   : > { %2079 = vmatmul.msk.bf16.vlgmr.msra.gmra.mxu3 %vm379_vm0, %v1851_v54 }
 0x5f4   : > { %v1870_v4 = vpop.f32.mrf.mxu3 }
 0x5f5   : > { %v1874_v63 = vsel %vm379_vm0, %v1870_v4, 0.0 }
 0x5f6   : > { %1875 = vadd.xlane.f32.xlu0 %v1874_v63 }
 0x5fc   : > { %v1872_v55 = vpop.f32.mrf.mxu3 }
 0x669   : > { %v1876_v31 = vpop.xlane.xlu0 %1875 }
 0x66a   : > { %v1877_v42 = vmul.f32 %v1876_v31, %v2757_v12 }
 0x66c   : > { %v1878_v61 = vsub.f32 %v1870_v4, %v1877_v42 }
 0x66e   : > { %v1879_v0 = vmul.f32 %v1878_v61, %v1878_v61 }
 0x670   : > { %v1880_v56 = vsel %vm379_vm0, %v1879_v0, 0.0 }
 0x671   : > { %1881 = vadd.xlane.f32.xlu1 %v1880_v56 }
 0x6e4   : > { %v1882_v7 = vpop.xlane.xlu1 %1881 }
 0x6e5   : > { %v1883_v34 = vmul.f32 %v1882_v7, %v2757_v12 }
 0x6e7   : > { %v1884_v36 = vadd.f32 1e-05, %v1883_v34 }
 0x6e9   : > { %2258 = vrsqrt.f32 %v1884_v36  ;;  %vm1891_vm12 = vweird.f32 %v1884_v36 }
 0x6ef   : > { %v2259_v27 = vpop.eup %2258 }
 0x6f0   : > { %v1886_v51 = vmul.f32 %v2259_v27, %v1884_v36  ;;  %vm1892_vm11 = vweird.f32 %v2259_v27 }
 0x6f1   : > { %vm1893_vm14 = vmor %vm1891_vm12, %vm1892_vm11 }
 0x6f2   : > { %v1887_v22 = vmul.f32 %v2259_v27, %v1886_v51 }
 0x6f4   : > { %v1888_v60 = vmul.f32 0.5, %v1887_v22 }
 0x6f6   : > { %v1889_v20 = vsub.f32 1.5, %v1888_v60 }
 0x6f8   : > { %v1890_v35 = vmul.f32 %v2259_v27, %v1889_v20 }
 0x6fa   : > { %v1894_v12 = vsel %vm1893_vm14, %v2259_v27, %v1890_v35 }
 0x6fb   : > { %v1895_v2 = vmul.f32 %v1894_v12, %v1878_v61 }
 0x6fd   : > { %v1897_v6 = vmul.f32 %v1896_v62, %v1895_v2 }
 0x6ff   : > { %v1899_v1 = vadd.f32 %v1898_v3, %v1897_v6 }
 0x701   : > { %1900 = vst.msk [vmem:[%s374_s4] sm:$0xff] %vm379_vm0, %v1899_v1 }
 0x702   : > { %2468 = shalt.err (!%p2465_p10)
}
 0x703   : > { %2105 = dma.vmem_to_hbm [thread:$0]  (%p2669_p3), %s1915_s14, 128, %s1917_s16, %s1902_s25  }
 0x704 PF: > { %s1928_s17 = sand.u32 1, %s2511_s21   ;;  %p3395_p12 = scmp.ge.s32.totalorder %s2523_s24, 2 }
 0x705   : > { %s1929_s7 = scalar_lea.sflag [#allocation4], %s1928_s17 }
 0x706   : > { %p2128_p13 = pnand %p3395_p12, %p2611_p6 }
 0x708   : > { %p2129_p0 = pneg %p2128_p13 }
 0x70a   : > { %2506 = dma.done.wait (%p2129_p0), %s1929_s7, 128  }
 0x70b   : > { %2508 = vsyncadd (%p2129_p0), %s1929_s7, 4294967168  ;;  %s3396_s2 = sld [smem:[#allocation20_spill]]  ;;  %p24_p5 = scmp.ge.s32.totalorder %s2659_s13, 4  }
 0x70c   : > { %s3397_s21 = smov %s2515_s22  ;;  %s3398_s22 = smov %s2519_s23 }
 0x70d   : > { %s3400_s24 = smov %s2659_s13  ;;  %26 = sbr.rel (!%p24_p5) target bundleno = 14 (0xe), region = 118 }
 0x711   : > { %s3399_s23 = smov %s3396_s2 }
 0x712   :  { %1935 = vsyncpa [#allocation3], 1 }
 0x713   :  { %1937 = vsyncpa [#allocation3 + $0x1], 1 }
 0x714   :  { %1938 = vsyncpa [#allocation6], 1 }
 0x715   :  { %1940 = vsyncpa [#allocation6 + $0x1], 1 }
 0x716   :  { %1941 = vsyncpa [#allocation9], 1 }
 0x717   :  { %1942 = vsyncpa [#allocation12], 1 }
 0x718   :  { %1943 = vsyncpa [#allocation4], 1 }
 0x719   :  { %1945 = vsyncpa [#allocation4 + $0x1], 1 }

</bundles_post_ra>
